<compile_context>
chip_gen: v5e
topology: v5e:2x2
jax: 0.10.0
libtpu: 0.0.40
codegen_flags: <defaults>
</compile_context>

<pallas_src>
import math
import numpy as np
import jax
import jax.numpy as jnp
from jax.experimental import pallas as pl
from jax.experimental.pallas import tpu as pltpu

LN_EPS = 1e-6
SN_EPS = 1e-5


# ---------------- kernels ----------------

def _sublayer_layernorm_kernel(x_ref, a_ref, b_ref, w_ref, bias_ref, o_ref):
    # x_ref: (TM, D) f32   a/b/bias: (1, D) f32   w_ref: (D, D) bf16
    x = x_ref[...]
    d = x.shape[-1]
    mu = jnp.mean(x, axis=-1, keepdims=True)
    xc = x - mu
    # torch .std() is the *unbiased* estimator (divide by D-1); eps added to sigma.
    var = jnp.sum(xc * xc, axis=-1, keepdims=True) / (d - 1)
    inv_sigma = pl.reciprocal(jnp.sqrt(var) + LN_EPS, approx=False)   # exact; mem-bound kernel
    normed = a_ref[...] * (xc * inv_sigma) + b_ref[...]
    # bf16 operands into the MXU, f32 accumulation; residual stays f32.
    h = jnp.dot(normed.astype(jnp.bfloat16), w_ref[...],
                preferred_element_type=jnp.float32) + bias_ref[...]
    o_ref[...] = x + h  # dropout == identity (eval)


def _sublayer_scalenorm_kernel(x_ref, g_ref, w_ref, bias_ref, o_ref):
    # x_ref: (TM, D) f32   g_ref: (1, 1) f32 in SMEM   w_ref: (D, D) bf16
    x = x_ref[...]
    nrm = jnp.sqrt(jnp.sum(x * x, axis=-1, keepdims=True))
    inv_nrm = pl.reciprocal(jnp.maximum(nrm, SN_EPS), approx=False)   # clamp(min=eps)
    normed = x * (g_ref[0, 0] * inv_nrm)
    h = jnp.dot(normed.astype(jnp.bfloat16), w_ref[...],
                preferred_element_type=jnp.float32) + bias_ref[...]
    o_ref[...] = x + h  # dropout == identity (eval)


# ---------------- tiling / one-time param prep ----------------

def _choose_tm(n_rows, max_tm=1024):
    """Row tile: large enough for the HBM roofline; for small inputs, sized so
    the 1-D grid has an even step count -> both v7x TensorCores load-balance."""
    if n_rows <= 2 * max_tm:
        return max(8, ((pl.cdiv(n_rows, 2) + 7) // 8) * 8)   # 1 or 2 balanced steps
    return max_tm


def prepare_layernorm_params(a, b, w, bias):
    """Hoisted out of the per-call path: bf16 weight + (1, D) f32 vectors."""
    D = w.shape[0]
    return (jnp.asarray(a, jnp.float32).reshape(1, D),
            jnp.asarray(b, jnp.float32).reshape(1, D),
            jnp.asarray(w, jnp.bfloat16),
            jnp.asarray(bias, jnp.float32).reshape(1, D))


def prepare_scalenorm_params(g, w, bias):
    D = w.shape[0]
    return (jnp.asarray(g, jnp.float32).reshape(1, 1),
            jnp.asarray(w, jnp.bfloat16),
            jnp.asarray(bias, jnp.float32).reshape(1, D))


# ---------------- wrappers ----------------

def sublayer_connection_layernorm(x, a2, b2, w_bf16, bias2, *, max_tm=1024):
    B, S, D = x.shape
    N = B * S
    tm = _choose_tm(N, max_tm)
    xf = x.reshape(N, D)                               # free reshape; no pad, no post-slice
    const = dict(pipeline_mode=pl.Buffered(1))         # never re-fetched across grid steps
    out = pl.pallas_call(
        _sublayer_layernorm_kernel,
        out_shape=jax.ShapeDtypeStruct((N, D), jnp.float32),
        grid_spec=pltpu.PrefetchScalarGridSpec(
            num_scalar_prefetch=0,
            grid=(pl.cdiv(N, tm),),                    # ragged last block: OOB rows masked on store
            in_specs=[
                pl.BlockSpec((tm, D), lambda i: (i, 0)),           # x tile
                pl.BlockSpec((1, D), lambda i: (0, 0), **const),   # a (gamma)
                pl.BlockSpec((1, D), lambda i: (0, 0), **const),   # b (beta)
                pl.BlockSpec((D, D), lambda i: (0, 0), **const),   # sublayer weight (bf16)
                pl.BlockSpec((1, D), lambda i: (0, 0), **const),   # sublayer bias
            ],
            out_specs=pl.BlockSpec((tm, D), lambda i: (i, 0)),
        ),
        compiler_params=pltpu.CompilerParams(
            dimension_semantics=("parallel",)),
    )(xf, a2, b2, w_bf16, bias2)
    return out.reshape(B, S, D)


def sublayer_connection_scalenorm(x, g2, w_bf16, bias2, *, max_tm=1024):
    B, S, D = x.shape
    N = B * S
    tm = _choose_tm(N, max_tm)
    xf = x.reshape(N, D)
    const = dict(pipeline_mode=pl.Buffered(1))
    out = pl.pallas_call(
        _sublayer_scalenorm_kernel,
        out_shape=jax.ShapeDtypeStruct((N, D), jnp.float32),
        grid_spec=pltpu.PrefetchScalarGridSpec(
            num_scalar_prefetch=0,
            grid=(pl.cdiv(N, tm),),
            in_specs=[
                pl.BlockSpec((tm, D), lambda i: (i, 0)),                 # x tile
                pl.BlockSpec(memory_space=pltpu.MemorySpace.SMEM),       # scalar g (SMEM)
                pl.BlockSpec((D, D), lambda i: (0, 0), **const),         # sublayer weight (bf16)
                pl.BlockSpec((1, D), lambda i: (0, 0), **const),         # sublayer bias
            ],
            out_specs=pl.BlockSpec((tm, D), lambda i: (i, 0)),
        ),
        compiler_params=pltpu.CompilerParams(
            dimension_semantics=("parallel",)),
    )(xf, g2, w_bf16, bias2)
    return out.reshape(B, S, D)


# ---------------- pure-JAX references (f32) ----------------

def _ref_layernorm(x, a, b, w, bias):
    mu = x.mean(-1, keepdims=True)
    xc = x - mu
    sigma = jnp.sqrt((xc * xc).sum(-1, keepdims=True) / (x.shape[-1] - 1))
    normed = a * xc / (sigma + LN_EPS) + b
    return x + normed @ w + bias


def _ref_scalenorm(x, g, w, bias):
    nrm = jnp.maximum(jnp.sqrt((x * x).sum(-1, keepdims=True)), SN_EPS)
    normed = x * (g / nrm)
    return x + normed @ w + bias


# ---------------- main ----------------

if __name__ == "__main__":
    # N = B*S = 520 rows: not a multiple of the chosen row tile, so the ragged
    # last-block path is exercised, and the tile chooser yields a 2-step grid
    # (balanced across both v7x TensorCores).
    B, S, D = 4, 130, 128
    key = jax.random.PRNGKey(0)
    kx, kw, kb = jax.random.split(key, 3)

    x = jax.random.normal(kx, (B, S, D), dtype=jnp.float32)

    # SublayerConnection parameters (per module __init__):
    #   LayerNorm: a = ones(size), b = zeros(size)
    #   ScaleNorm: scale = sqrt(size)
    a = jnp.ones((D,), dtype=jnp.float32)
    b = jnp.zeros((D,), dtype=jnp.float32)
    g = jnp.float32(math.sqrt(D))

    # Synthetic sublayer = Linear(size, size); weight stored as (D_in, D_out).
    w = jax.random.normal(kw, (D, D), dtype=jnp.float32) / math.sqrt(D)
    bias = jax.random.normal(kb, (D,), dtype=jnp.float32) * 0.01

    # One-time param prep (bf16 weight cast / reshapes hoisted out of calls).
    a2, b2, w_bf16, bias2 = prepare_layernorm_params(a, b, w, bias)
    g2, w_bf16_s, bias2_s = prepare_scalenorm_params(g, w, bias)

    # Only remaining deviation from the f32 torch reference is the bf16 matmul
    # operands (f32 accumulation); norm reciprocals are now exact.
    TOL = dict(atol=2e-2, rtol=2e-2)

    # LayerNorm variant (scale_norm=False)
    y_ln = sublayer_connection_layernorm(x, a2, b2, w_bf16, bias2)
    jax.block_until_ready(y_ln)
    ref_ln = _ref_layernorm(x, a, b, w, bias)
    assert np.allclose(np.asarray(y_ln), np.asarray(ref_ln), **TOL)

    # ScaleNorm variant (scale_norm=True)
    y_sn = sublayer_connection_scalenorm(x, g2, w_bf16_s, bias2_s)
    jax.block_until_ready(y_sn)
    ref_sn = _ref_scalenorm(x, g, w, bias)
    assert np.allclose(np.asarray(y_sn), np.asarray(ref_sn), **TOL)

    print("KERNEL_OK")
</pallas_src>

<mosaic_0001>
module attributes {stable_mosaic.version = 11 : i64} {
  func.func @_sublayer_layernorm_kernel(%arg0: i32, %arg1: memref<264x128xf32, #tpu.memory_space<vmem>>, %arg2: memref<1x128xf32, #tpu.memory_space<vmem>>, %arg3: memref<1x128xf32, #tpu.memory_space<vmem>>, %arg4: memref<128x128xbf16, #tpu.memory_space<vmem>>, %arg5: memref<1x128xf32, #tpu.memory_space<vmem>>, %arg6: memref<264x128xf32, #tpu.memory_space<vmem>>) attributes {dimension_semantics = [#tpu.dimension_semantics<parallel>], iteration_bounds = array<i64: 2>, scalar_prefetch = 0 : i64, scratch_operands = 0 : i64, tpu.core_type = #tpu.core_type<tc>, window_params = [{transform_indices = @transform_0, window_bounds = array<i64: 264, 128>}, {pipeline_mode = #tpu.pipeline_mode<synchronous>, transform_indices = @transform_1, window_bounds = array<i64: 1, 128>}, {pipeline_mode = #tpu.pipeline_mode<synchronous>, transform_indices = @transform_2, window_bounds = array<i64: 1, 128>}, {pipeline_mode = #tpu.pipeline_mode<synchronous>, transform_indices = @transform_3, window_bounds = array<i64: 128, 128>}, {pipeline_mode = #tpu.pipeline_mode<synchronous>, transform_indices = @transform_4, window_bounds = array<i64: 1, 128>}, {transform_indices = @transform_5, window_bounds = array<i64: 264, 128>}]} {
    %c0 = arith.constant 0 : index
    %c0_0 = arith.constant 0 : index
    %0 = vector.load %arg1[%c0, %c0_0] : memref<264x128xf32, #tpu.memory_space<vmem>>, vector<264x128xf32>
    %cst = arith.constant dense<0.000000e+00> : vector<264xf32>
    %1 = vector.multi_reduction <add>, %0, %cst [1] : vector<264x128xf32> to vector<264xf32>
    %2 = vector.shape_cast %1 : vector<264xf32> to vector<264x1xf32>
    %cst_1 = arith.constant 1.280000e+02 : f32
    %3 = vector.broadcast %cst_1 : f32 to vector<264x1xf32>
    %4 = arith.divf %2, %3 : vector<264x1xf32>
    %5 = vector.broadcast %4 : vector<264x1xf32> to vector<264x128xf32>
    %6 = arith.subf %0, %5 : vector<264x128xf32>
    %7 = arith.mulf %6, %6 : vector<264x128xf32>
    %cst_2 = arith.constant dense<0.000000e+00> : vector<264xf32>
    %8 = vector.multi_reduction <add>, %7, %cst_2 [1] : vector<264x128xf32> to vector<264xf32>
    %9 = vector.shape_cast %8 : vector<264xf32> to vector<264x1xf32>
    %cst_3 = arith.constant 1.270000e+02 : f32
    %10 = vector.broadcast %cst_3 : f32 to vector<264x1xf32>
    %11 = arith.divf %9, %10 : vector<264x1xf32>
    %12 = math.sqrt %11 : vector<264x1xf32>
    %cst_4 = arith.constant 9.99999997E-7 : f32
    %13 = vector.broadcast %cst_4 : f32 to vector<264x1xf32>
    %14 = arith.addf %12, %13 : vector<264x1xf32>
    %15 = tpu.reciprocal %14 : vector<264x1xf32> -> vector<264x1xf32>
    %c0_5 = arith.constant 0 : index
    %c0_6 = arith.constant 0 : index
    %16 = vector.load %arg2[%c0_5, %c0_6] : memref<1x128xf32, #tpu.memory_space<vmem>>, vector<1x128xf32>
    %17 = vector.broadcast %15 : vector<264x1xf32> to vector<264x128xf32>
    %18 = arith.mulf %6, %17 : vector<264x128xf32>
    %19 = vector.broadcast %16 : vector<1x128xf32> to vector<264x128xf32>
    %20 = arith.mulf %19, %18 : vector<264x128xf32>
    %c0_7 = arith.constant 0 : index
    %c0_8 = arith.constant 0 : index
    %21 = vector.load %arg3[%c0_7, %c0_8] : memref<1x128xf32, #tpu.memory_space<vmem>>, vector<1x128xf32>
    %22 = vector.broadcast %21 : vector<1x128xf32> to vector<264x128xf32>
    %23 = arith.addf %20, %22 : vector<264x128xf32>
    %24 = arith.truncf %23 : vector<264x128xf32> to vector<264x128xbf16>
    %c0_9 = arith.constant 0 : index
    %c0_10 = arith.constant 0 : index
    %25 = vector.load %arg4[%c0_9, %c0_10] : memref<128x128xbf16, #tpu.memory_space<vmem>>, vector<128x128xbf16>
    %cst_11 = arith.constant dense<0.000000e+00> : vector<264x128xf32>
    %26 = tpu.matmul %24, %25, %cst_11 {dimension_numbers = #tpu.dot_dimension_numbers<[1], [0], [0], [1], [0, 0, 1, 1], [], []>} : vector<264x128xbf16>, vector<128x128xbf16>, vector<264x128xf32> -> vector<264x128xf32>
    %c0_12 = arith.constant 0 : index
    %c0_13 = arith.constant 0 : index
    %27 = vector.load %arg5[%c0_12, %c0_13] : memref<1x128xf32, #tpu.memory_space<vmem>>, vector<1x128xf32>
    %28 = vector.broadcast %27 : vector<1x128xf32> to vector<264x128xf32>
    %29 = arith.addf %26, %28 : vector<264x128xf32>
    %30 = arith.addf %0, %29 : vector<264x128xf32>
    %c0_14 = arith.constant 0 : index
    %c0_15 = arith.constant 0 : index
    %31 = vector.load %arg6[%c0_14, %c0_15] : memref<264x128xf32, #tpu.memory_space<vmem>>, vector<264x128xf32>
    tpu.vector_store %arg6[%c0_14, %c0_15], %30 {strides = array<i32>} : memref<264x128xf32, #tpu.memory_space<vmem>>, vector<264x128xf32>,
    return
  }
  func.func @transform_0(%arg0: i32) -> (i32, i32) {
    %c0_i32 = arith.constant 0 : i32
    %c0_i32_0 = arith.constant 0 : i32
    return %arg0, %c0_i32 : i32, i32
  }
  func.func @transform_1(%arg0: i32) -> (i32, i32) {
    %c0_i32 = arith.constant 0 : i32
    %c0_i32_0 = arith.constant 0 : i32
    %c0_i32_1 = arith.constant 0 : i32
    return %c0_i32, %c0_i32_0 : i32, i32
  }
  func.func @transform_2(%arg0: i32) -> (i32, i32) {
    %c0_i32 = arith.constant 0 : i32
    %c0_i32_0 = arith.constant 0 : i32
    %c0_i32_1 = arith.constant 0 : i32
    return %c0_i32, %c0_i32_0 : i32, i32
  }
  func.func @transform_3(%arg0: i32) -> (i32, i32) {
    %c0_i32 = arith.constant 0 : i32
    %c0_i32_0 = arith.constant 0 : i32
    %c0_i32_1 = arith.constant 0 : i32
    return %c0_i32, %c0_i32_0 : i32, i32
  }
  func.func @transform_4(%arg0: i32) -> (i32, i32) {
    %c0_i32 = arith.constant 0 : i32
    %c0_i32_0 = arith.constant 0 : i32
    %c0_i32_1 = arith.constant 0 : i32
    return %c0_i32, %c0_i32_0 : i32, i32
  }
  func.func @transform_5(%arg0: i32) -> (i32, i32) {
    %c0_i32 = arith.constant 0 : i32
    %c0_i32_0 = arith.constant 0 : i32
    return %arg0, %c0_i32 : i32, i32
  }
}

</mosaic_0001>

<bundles_post_ra>
// kernel: tpu_custom_call.1
= control target key start
LH: loop header
LB: loop body
LE: loop exit
PB: predicated region body
PF: predicated region fallthrough
CT: control target
= control target key end

     0   :  { %s4538_s0 = inlined_call_operand.hbm [shape: f32[520,128], index: 0, kind: input, shape index: {}]   ;;  %s4539_s1 = inlined_call_operand.hbm [shape: f32[1,128], index: 1, kind: input, shape index: {}]   ;;  %s4540_s2 = inlined_call_operand.vmem [shape: f32[1,128], index: 2, kind: input, shape index: {}]   ;;  %s4541_s3 = inlined_call_operand.hbm [shape: bf16[128,128], index: 3, kind: input, shape index: {}]   ;;  %s4542_s4 = inlined_call_operand.vmem [shape: f32[1,128], index: 4, kind: input, shape index: {}]   ;;  %s4543_s5 = inlined_call_operand.hbm [shape: f32[520,128], index: 5, kind: output, shape index: {}]  }
   0x1   :  { %4579 = sst [smem:[#allocation47_spill]] %s4539_s1 }
   0x2   :  { %4580 = sst [smem:[#allocation48_spill]] %s4541_s3 }
   0x3   :  { %10 = vsyncpa [#allocation3], 0 }
   0x4   :  { %12 = vsyncpa [#allocation3 + $0x1], 0 }
   0x5   :  { %13 = vsyncpa [#allocation6], 0 }
   0x6   :  { %14 = vsyncpa [#allocation4], 0 }
   0x7   :  { %16 = vsyncpa [#allocation4 + $0x1], 0  ;;  %s2515_s18 = smov 0   ;;  %s2517_s19 = smov 0  }
   0x8   :  { %s2519_s20 = smov 0   ;;  %s2521_s21 = smov 0  }
   0x9 LB: > { %s2536_s22 = sadd.s32 4294967295, %s2471_s21   ;;  %s1961_s23 = sadd.s32 4294967294, %s2471_s21   ;;  %s2471_s21 = sphi %s2521_s21, %s4746_s21   ;;  %s2467_s20 = sphi %s2519_s20, %s4745_s20   ;;  %s2463_s19 = sphi %s2517_s19, %s4744_s19   ;;  %s2459_s18 = sphi %s2515_s18, %s4743_s18  }
   0xa   : > { %s2540_s24 = sadd.s32 1, %s2471_s21   ;;  %s29_s25 = sadd.s32 1, %s2467_s20 }
   0xb   : > { %s26_s26 = ssub.s32 %s2471_s21, %s2540_s24  ;;  %p36_p0 = scmp.ne.s32.totalorder %s2467_s20, %s2463_s19 }
   0xc   : > { %p27_p1 = scmp.eq.s32.totalorder %s26_s26, 0  ;;  %p37_p2 = scmp.eq.s32.totalorder %s2471_s21, 0 }
   0xd   : > { %p42_p3 = scmp.ne.s32.totalorder %s2463_s19, %s2459_s18  ;;  %p4545_p4 = scmp.eq.s32.totalorder %s2536_s22, 0 }
   0xe   : > { %s2552_s27 = scalar_select %p27_p1, %s2467_s20, %s29_s25  }
   0xf   : > { %p2554_p5 = por %p37_p2, %p36_p0  ;;  %p2560_p6 = por %p4545_p4, %p42_p3 }
  0x10   : > { %p150_p7 = scmp.eq.s32.totalorder %s2536_s22, 1  ;;  %p156_p8 = scmp.eq.s32.totalorder %s1961_s23, 1 }
  0x11   : > { %p1962_p9 = scmp.ge.s32.totalorder %s2471_s21, 1  ;;  %p163_p10 = scmp.lt.s32.totalorder %s2471_s21, 3 }
  0x12   : > { %p2567_p11 = por %p150_p7, %p36_p0  ;;  %p2571_p12 = por %p156_p8, %p42_p3 }
  0x13   : > { %p2575_p13 = pnand %p1962_p9, %p163_p10  ;;  %s4586_s1 = sld [smem:[#allocation47_spill]] }
  0x14   : > { %s4584_s6 = scalar_select %p2571_p12, 1, 0 }
  0x15   : > { %p2059_p1 = pneg %p2575_p13  ;;  %s2473_s11 = smov [#allocation5]  }
  0x16   : > { %s177_s12 = sshll.u32 %s2473_s11, 4  ;;  %s4587_s3 = sld [smem:[#allocation48_spill]]  ;;  %s178_s12 = int_to_ptr.vmem [resolvable:$true] %s177_s12 }
  0x17   : > { %p2060_p0 = pnand %p2059_p1, %p4545_p4  ;;  %s2474_s16 = smov [#allocation7]  }
  0x18   : > { %s191_s17 = sshll.u32 %s2474_s16, 4  ;;  %s2475_s23 = smov 64   ;;  %s192_s17 = int_to_ptr.vmem [resolvable:$true] %s191_s17 }
  0x19   : > { %s175_s10 = sshll.u32 %s4586_s1, 4  ;;  %s2476_s25 = smov 4   ;;  %s176_s10 = int_to_ptr.hbm [resolvable:$true] %s175_s10 }
  0x1a   : > { %2062 = dma.hbm_to_vmem [thread:$0]  (!%p2060_p0), %s176_s10, 16, %s178_s12, [#allocation6]  }
  0x1b   : > { %p4544_p2 = scmp.ge.s32.totalorder %s2471_s21, 2 }
  0x1c   : > { %s189_s15 = sshll.u32 %s4587_s3, 4  ;;  %s190_s15 = int_to_ptr.hbm [resolvable:$true] %s189_s15 }
  0x1d   : > { %2065 = dma.hbm_to_vmem [thread:$0]  (!%p2060_p0), %s190_s15, 1024, %s192_s17, [#allocation6], %s2475_s23, %s2475_s23, %s2476_s25  }
  0x1e   : > { %204 = sbr.rel (%p4544_p2) target bundleno = 73 (0x49), region = 32 }
  0x23   : > { %207 = sbr.rel (!%p2554_p5) target bundleno = 73 (0x49), region = 36  ;;  %s208_s26 = sand.u32 (%p2554_p5), 1, %s2467_s20  }
  0x24   : > { %s213_s8 = smul.u32 (%p2554_p5), 33, %s2471_s21  ;;  %s2599_s14 = scalar_lea.sflag (%p2554_p5), [#allocation3], %s208_s26 }
  0x25   : > { %s2047_s9 = smul.u32 (%p2554_p5), 264, %s208_s26 }
  0x26   : > { %s214_s11 = ssub.s32 (%p2554_p5), 65, %s213_s8 }
  0x27   : > { %p215_p3 = scmp.lt.s32.totalorder (%p2554_p5), %s214_s11, 33  ;;  %s212_s15 = scalar_lea.vmem (%p2554_p5), [#allocation2], %s2047_s9 }
  0x29   : > { %s4748_s11 = smov (!%p215_p3, %s214_s11), 33 }
  0x2a   : > { %s1966_s10 = sshll.u32 %s4748_s11, 3 }
  0x2b   : > { %s218_s12 = ssub.s32 264, %s1966_s10 }
  0x2c   : > { %s219_s13 = sshll.u32 %s218_s12, 4 }
  0x2d   : > { %220 = vsyncadd %s2599_s14, %s219_s13  ;;  %p2602_p5 = scmp.ne.s32.totalorder %s1966_s10, 0  ;;  %s2013_s16 = smul.u32 264, %s2471_s21 }
  0x2e   : > { %s2607_s17 = sshll.u32 %s212_s15, 4  ;;  %s1970_s23 = sshll.u32 %s4748_s11, 7  ;;  %s228_s17 = int_to_ptr.vmem [resolvable:$true] %s2607_s17 }
  0x2f   : > { %s223_s26 = scalar_lea.hbm %s4538_s0, %s2013_s16  ;;  %s2353_s10 = sshrl.u32 %s1970_s23, 4 }
  0x30   : > { %s225_s9 = sshll.u32 %s223_s26, 4  ;;  %s2362_s3 = scalar_lea.hbm %s4538_s0, 520  ;;  %s2614_s9 = int_to_ptr.hbm [resolvable:$true] %s225_s9 }
  0x31   : > { %s2351_s12 = sshra.s32 %s2614_s9, 4  ;;  %s2352_s12 = int_to_ptr.hbm [resolvable:$true] %s2351_s12 }
  0x32   : > { %s2358_s13 = scalar_lea.hbm %s2352_s12, %s2353_s10  ;;  %p2363_p10 = scmp.lt.s32.totalorder %s2352_s12, %s4538_s0 }
  0x33   : > { %p2359_p7 = scmp.ne.s32.totalorder %s2352_s12, %s2358_s13  ;;  %p2364_p1 = scmp.lt.s32.totalorder %s2362_s3, %s2358_s13 }
  0x35   : > { %p2360_p8 = pnand %p2359_p7, %p2602_p5  ;;  %p2365_p0 = por %p2364_p1, %p2363_p10 }
  0x37   : > { %p2361_p9 = pneg %p2360_p8 }
  0x39   : > { %p2366_p3 = pnand %p2365_p0, %p2361_p9 }
  0x3b   : > { %2369 = shalt.err (!%p2366_p3)
}
  0x3c   : > { %s2370_s8 = sshra.s32 %s228_s17, 4  ;;  %s2477_s1 = smov [#allocation2]   ;;  %s2371_s8 = int_to_ptr.vmem [resolvable:$true] %s2370_s8 }
  0x3d   : > { %s2377_s26 = scalar_lea.vmem %s2371_s8, %s2353_s10  ;;  %s2381_s15 = scalar_lea.vmem %s2477_s1, 528 }
  0x3e   : > { %p2378_p7 = scmp.ne.s32.totalorder %s2371_s8, %s2377_s26  ;;  %p2383_p4 = scmp.lt.s32.totalorder %s2381_s15, %s2377_s26 }
  0x40   : > { %p2379_p8 = pnand %p2378_p7, %p2602_p5 }
  0x42   : > { %p2380_p2 = pneg %p2379_p8 }
  0x44   : > { %p2385_p12 = pnand %p2383_p4, %p2380_p2 }
  0x46   : > { %2388 = shalt.err (!%p2385_p12)
}
  0x47   : > { %s2478_s12 = smov 128   ;;  %s2479_s3 = smov 8  }
  0x48   : > { %233 = dma.hbm_to_vmem [thread:$0]  (%p2602_p5), %s2614_s9, %s1970_s23, %s228_s17, %s2599_s14, %s2478_s12, %s2478_s12, %s2479_s3  }
  0x49 PF: > { %239 = sbr.rel (%p2575_p13) target bundleno = 778 (0x30a), region = 40 }
  0x4e   : > { %s2642_s10 = sand.u32 1, %s2463_s19  }
  0x4f   : > { %s2048_s13 = smul.u32 264, %s2642_s10  ;;  %s242_s25 = scalar_lea.sflag [#allocation3], %s2642_s10 }
  0x51   : > { %s2648_s16 = scalar_lea.vmem [#allocation2], %s2048_s13 }
  0x52   : > { %2446 = dma.done.wait (%p2560_p6), %s242_s25, 4224  }
  0x53   : > { %2448 = vsyncadd (%p2560_p6), %s242_s25, 4294963072  ;;  %p4589_p4 = scmp.eq.s32.totalorder %s2536_s22, 0 }
  0x55   : > { %2450 = dma.done.wait (%p4589_p4), [#allocation6], 1040   ;;  %p4590_p12 = pmov %p4589_p4 }
  0x56   : > { %v2659_v0 = vld [vmem:[%s2648_s16 + $0xd0] sm:$0xff]  ;;  %v2665_v2 = vld [vmem:[%s2648_s16 + $0x80] sm:$0xff]  ;;  %v2671_v3 = vld [vmem:[%s2648_s16 + $0xd8] sm:$0xff]  ;;  %v2480_v33 = vmov 128.0   ;;  %s4355_s23 = scalar_lea.vmem [#allocation8], %s2048_s13  ;;  %s1847_s9 = scalar_lea.sflag [#allocation4], %s2642_s10 }
  0x57   : > { %2452 = vsyncadd (%p4590_p12), [#allocation6], 4294966256  ;;  %v2662_v1 = vld [vmem:[%s2648_s16 + $0x90] sm:$0xff]  ;;  %378 = vadd.xlane.f32.xlu2 %v2659_v0  ;;  %358 = vadd.xlane.f32.xlu0 %v2665_v2  ;;  %v2674_v4 = vld [vmem:[%s2648_s16 + $0x98] sm:$0xff]  ;;  %2120 = vrcp.f32 %v2480_v33  ;;  %s1854_s8 = smul.u32 (%p2567_p11), 33, %s2536_s22 }
  0x58   : > { %362 = vadd.xlane.f32.xlu1 %v2662_v1  ;;  %v2677_v5 = vld [vmem:[%s2648_s16 + $0x88] sm:$0xff]  ;;  %v2683_v6 = vld [vmem:[%s2648_s16 + $0x40] sm:$0xff]  ;;  %v2707_v12 = vld [vmem:[%s2648_s16 + $0x10] sm:$0xff] }
  0x59   : > { %v2686_v7 = vld [vmem:[%s2648_s16 + $0x8] sm:$0xff]  ;;  %v2689_v8 = vld [vmem:[%s2648_s16] sm:$0xff]  ;;  %v2719_v15 = vld [vmem:[%s2648_s16 + $0x58] sm:$0xff]  ;;  %s1855_s26 = ssub.s32 (%p2567_p11), 65, %s1854_s8 }
  0x5a   : > { %v2695_v9 = vld [vmem:[%s2648_s16 + $0xa8] sm:$0xff]  ;;  %v2698_v10 = vld [vmem:[%s2648_s16 + $0xa0] sm:$0xff]  ;;  %v2722_v16 = vld [vmem:[%s2648_s16 + $0x50] sm:$0xff]  ;;  %p1856_p6 = scmp.lt.s32.totalorder (%p2567_p11), %s1855_s26, 33 }
  0x5b   : > { %v2701_v11 = vld [vmem:[%s2648_s16 + $0x48] sm:$0xff]  ;;  %v2713_v14 = vld [vmem:[%s2648_s16 + $0xe0] sm:$0xff]  ;;  %v2725_v17 = vld [vmem:[%s2648_s16 + $0x18] sm:$0xff] }
  0x5c   : > { %v2710_v13 = vld [vmem:[%s2648_s16 + $0xe8] sm:$0xff]  ;;  %v2731_v18 = vld [vmem:[%s2648_s16 + $0xb0] sm:$0xff]  ;;  %v2737_v20 = vld [vmem:[%s2648_s16 + $0xb8] sm:$0xff] }
  0x5d   : > { %v2734_v19 = vld [vmem:[%s2648_s16 + $0xf0] sm:$0xff]  ;;  %v2743_v21 = vld [vmem:[%s2648_s16 + $0xf8] sm:$0xff]  ;;  %v2746_v22 = vld [vmem:[%s2648_s16 + $0x28] sm:$0xff]  ;;  %v2121_v34 = vpop.eup %2120 }
  0x5e   : > { %v2749_v23 = vld [vmem:[%s2648_s16 + $0x20] sm:$0xff]  ;;  %v2758_v25 = vld [vmem:[%s2648_s16 + $0xc8] sm:$0xff]  ;;  %v2767_v27 = vld [vmem:[%s2648_s16 + $0x38] sm:$0xff]  ;;  %v393_v35 = vmul.f32 128.0, %v2121_v34  ;;  %vm397_vm0 = vweird.f32 %v2121_v34 }
  0x5f   : > { %380 = vadd.xlane.f32.xlu2 %v2671_v3  ;;  %360 = vadd.xlane.f32.xlu0 %v2677_v5  ;;  %v2755_v24 = vld [vmem:[%s2648_s16 + $0x60] sm:$0xff]  ;;  %v2761_v26 = vld [vmem:[%s2648_s16 + $0x68] sm:$0xff]  ;;  %v2779_v30 = vld [vmem:[%s2648_s16 + $0x70] sm:$0xff] }
  0x60   : > { %364 = vadd.xlane.f32.xlu1 %v2674_v4  ;;  %v2770_v28 = vld [vmem:[%s2648_s16 + $0x100] sm:$0xff]  ;;  %v2782_v31 = vld [vmem:[%s2648_s16 + $0x30] sm:$0xff]  ;;  %v2787_v32 = vld [vmem:[%s2648_s16 + $0x78] sm:$0xff]  ;;  %v394_v36 = vsub.f32 1.0, %v393_v35 }
  0x61   : > { %v2773_v29 = vld [vmem:[%s2648_s16 + $0xc0] sm:$0xff] }
  0x62   : > { %v395_v37 = vmul.f32 %v2121_v34, %v394_v36 }
  0x64   : > { %v396_v38 = vadd.f32 %v2121_v34, %v395_v37 }
  0x66   : > { %v2790_v39 = vsel %vm397_vm0, %v2121_v34, %v396_v38 }
  0x67   : > { %342 = vadd.xlane.f32.xlu2 %v2683_v6  ;;  %326 = vadd.xlane.f32.xlu0 %v2689_v8 }
  0x68   : > { %328 = vadd.xlane.f32.xlu1 %v2686_v7 }
  0x6f   : > { %368 = vadd.xlane.f32.xlu2 %v2695_v9  ;;  %344 = vadd.xlane.f32.xlu0 %v2701_v11 }
  0x70   : > { %366 = vadd.xlane.f32.xlu1 %v2698_v10 }
  0x77   : > { %330 = vadd.xlane.f32.xlu2 %v2707_v12  ;;  %382 = vadd.xlane.f32.xlu0 %v2713_v14 }
  0x78   : > { %384 = vadd.xlane.f32.xlu1 %v2710_v13 }
  0x7f   : > { %348 = vadd.xlane.f32.xlu2 %v2719_v15  ;;  %332 = vadd.xlane.f32.xlu0 %v2725_v17 }
  0x80   : > { %346 = vadd.xlane.f32.xlu1 %v2722_v16 }
  0x87   : > { %370 = vadd.xlane.f32.xlu2 %v2731_v18  ;;  %372 = vadd.xlane.f32.xlu0 %v2737_v20 }
  0x88   : > { %386 = vadd.xlane.f32.xlu1 %v2734_v19 }
  0x8f   : > { %388 = vadd.xlane.f32.xlu2 %v2743_v21  ;;  %334 = vadd.xlane.f32.xlu0 %v2749_v23 }
  0x90   : > { %336 = vadd.xlane.f32.xlu1 %v2746_v22 }
  0x97   : > { %350 = vadd.xlane.f32.xlu2 %v2755_v24  ;;  %352 = vadd.xlane.f32.xlu0 %v2761_v26 }
  0x98   : > { %376 = vadd.xlane.f32.xlu1 %v2758_v25 }
  0x9f   : > { %390 = vadd.xlane.f32.xlu2 %v2770_v28  ;;  %374 = vadd.xlane.f32.xlu0 %v2773_v29 }
  0xa0   : > { %340 = vadd.xlane.f32.xlu1 %v2767_v27 }
  0xa7   : > { %354 = vadd.xlane.f32.xlu2 %v2779_v30  ;;  %338 = vadd.xlane.f32.xlu0 %v2782_v31 }
  0xaf   : > { %356 = vadd.xlane.f32.xlu0 %v2787_v32 }
  0xca   : > { %v379_v40 = vpop.xlane.xlu2 %378  ;;  %v359_v42 = vpop.xlane.xlu0 %358 }
  0xcb   : > { %v363_v41 = vpop.xlane.xlu1 %362  ;;  %v415_v43 = vmul.f32 %v2790_v39, %v359_v42  ;;  %v425_v52 = vmul.f32 %v2790_v39, %v379_v40 }
  0xcc   : > { %v417_v58 = vmul.f32 %v2790_v39, %v363_v41 }
  0xcd   : > { %v2794_v44 = vsub.f32 %v2665_v2, %v415_v43  ;;  %v2819_v60 = vsub.f32 %v2659_v0, %v425_v52 }
  0xcf   : > { %v481_v45 = vmul.f32 %v2794_v44, %v2794_v44 }
  0xd1   : > { %530 = vadd.xlane.f32.xlu0 %v481_v45 }
  0xd2   : > { %v381_v46 = vpop.xlane.xlu2 %380  ;;  %v361_v50 = vpop.xlane.xlu0 %360 }
  0xd3   : > { %v365_v47 = vpop.xlane.xlu1 %364  ;;  %v426_v48 = vmul.f32 %v2790_v39, %v381_v46  ;;  %v416_v51 = vmul.f32 %v2790_v39, %v361_v50 }
  0xd4   : > { %v418_v49 = vmul.f32 %v2790_v39, %v365_v47 }
  0xd5   : > { %v2803_v53 = vsub.f32 %v2671_v3, %v426_v48  ;;  %v2809_v55 = vsub.f32 %v2677_v5, %v416_v51  ;;  %v2823_v3 = vsub.f32 %v2662_v1, %v417_v58  ;;  %v491_v5 = vmul.f32 %v2819_v60, %v2819_v60 }
  0xd6   : > { %v2806_v54 = vsub.f32 %v2674_v4, %v418_v49 }
  0xd7   : > { %v492_v57 = vmul.f32 %v2803_v53, %v2803_v53  ;;  %v482_v59 = vmul.f32 %v2809_v55, %v2809_v55  ;;  %4592 = vst [vmem:[#allocation13_spill] sm:$0xff] %v2823_v3  ;;  %v483_v35 = vmul.f32 %v2823_v3, %v2823_v3 }
  0xd8   : > { %4591 = vst [vmem:[#allocation12_spill] sm:$0xff] %v2806_v54  ;;  %v484_v56 = vmul.f32 %v2806_v54, %v2806_v54 }
  0xd9   : > { %532 = vadd.xlane.f32.xlu1 %v482_v59  ;;  %552 = vadd.xlane.f32.xlu0 %v492_v57 }
  0xda   : > { %536 = vadd.xlane.f32.xlu2 %v484_v56  ;;  %v343_v61 = vpop.xlane.xlu2 %342  ;;  %v327_v2 = vpop.xlane.xlu0 %326 }
  0xdb   : > { %v329_v62 = vpop.xlane.xlu1 %328  ;;  %v407_v63 = vmul.f32 %v2790_v39, %v343_v61  ;;  %v399_v33 = vmul.f32 %v2790_v39, %v327_v2 }
  0xdc   : > { %v400_v0 = vmul.f32 %v2790_v39, %v329_v62 }
  0xdd   : > { %v2826_v4 = vsub.f32 %v2683_v6, %v407_v63  ;;  %v2840_v6 = vsub.f32 %v2689_v8, %v399_v33 }
  0xde   : > { %v2837_v1 = vsub.f32 %v2686_v7, %v400_v0 }
  0xdf   : > { %4593 = vst [vmem:[#allocation14_spill] sm:$0xff] %v2826_v4  ;;  %v473_v34 = vmul.f32 %v2826_v4, %v2826_v4  ;;  %v465_v43 = vmul.f32 %v2840_v6, %v2840_v6 }
  0xe0   : > { %v466_v41 = vmul.f32 %v2837_v1, %v2837_v1 }
  0xe1   : > { %534 = vadd.xlane.f32.xlu1 %v483_v35  ;;  %514 = vadd.xlane.f32.xlu0 %v473_v34 }
  0xe2   : > { %550 = vadd.xlane.f32.xlu2 %v491_v5  ;;  %v369_v36 = vpop.xlane.xlu2 %368  ;;  %v345_v38 = vpop.xlane.xlu0 %344 }
  0xe3   : > { %v367_v37 = vpop.xlane.xlu1 %366  ;;  %v420_v40 = vmul.f32 %v2790_v39, %v369_v36  ;;  %v408_v42 = vmul.f32 %v2790_v39, %v345_v38 }
  0xe4   : > { %v419_v51 = vmul.f32 %v2790_v39, %v367_v37 }
  0xe5   : > { %v2849_v7 = vsub.f32 %v2695_v9, %v420_v40  ;;  %v2852_v8 = vsub.f32 %v2701_v11, %v408_v42 }
  0xe6   : > { %v2870_v57 = vsub.f32 %v2698_v10, %v419_v51 }
  0xe7   : > { %4594 = vst [vmem:[#allocation15_spill] sm:$0xff] %v2849_v7  ;;  %v486_v50 = vmul.f32 %v2849_v7, %v2849_v7  ;;  %v474_v11 = vmul.f32 %v2852_v8, %v2852_v8 }
  0xe8   : > { %4595 = vst [vmem:[#allocation16_spill] sm:$0xff] %v2852_v8  ;;  %v485_v10 = vmul.f32 %v2870_v57, %v2870_v57 }
  0xe9   : > { %498 = vadd.xlane.f32.xlu1 %v465_v43  ;;  %4598 = vst [vmem:[#allocation19_spill] sm:$0xff] %v2870_v57 }
  0xea   : > { %500 = vadd.xlane.f32.xlu2 %v466_v41  ;;  %v331_v45 = vpop.xlane.xlu2 %330  ;;  %v383_v47 = vpop.xlane.xlu0 %382 }
  0xeb   : > { %v385_v46 = vpop.xlane.xlu1 %384  ;;  %v427_v48 = vmul.f32 %v2790_v39, %v383_v47  ;;  %v401_v49 = vmul.f32 %v2790_v39, %v331_v45 }
  0xec   : > { %v428_v2 = vmul.f32 %v2790_v39, %v385_v46 }
  0xed   : > { %v2860_v9 = vsub.f32 %v2713_v14, %v427_v48  ;;  %v2867_v56 = vsub.f32 %v2707_v12, %v401_v49 }
  0xee   : > { %v2888_v33 = vsub.f32 %v2710_v13, %v428_v2 }
  0xef   : > { %4596 = vst [vmem:[#allocation17_spill] sm:$0xff] %v2860_v9  ;;  %v493_v52 = vmul.f32 %v2860_v9, %v2860_v9  ;;  %v467_v63 = vmul.f32 %v2867_v56, %v2867_v56 }
  0xf0   : > { %4597 = vst [vmem:[#allocation18_spill] sm:$0xff] %v2867_v56  ;;  %v494_v13 = vmul.f32 %v2888_v33, %v2888_v33 }
  0xf1   : > { %516 = vadd.xlane.f32.xlu1 %v474_v11  ;;  %554 = vadd.xlane.f32.xlu0 %v493_v52  ;;  %4601 = vst [vmem:[#allocation22_spill] sm:$0xff] %v2888_v33 }
  0xf2   : > { %540 = vadd.xlane.f32.xlu2 %v486_v50  ;;  %v349_v58 = vpop.xlane.xlu2 %348  ;;  %v333_v61 = vpop.xlane.xlu0 %332 }
  0xf3   : > { %v347_v59 = vpop.xlane.xlu1 %346  ;;  %v402_v14 = vmul.f32 %v2790_v39, %v333_v61  ;;  %v410_v62 = vmul.f32 %v2790_v39, %v349_v58 }
  0xf4   : > { %v409_v40 = vmul.f32 %v2790_v39, %v347_v59 }
  0xf5   : > { %v2878_v12 = vsub.f32 %v2725_v17, %v402_v14  ;;  %v2885_v0 = vsub.f32 %v2719_v15, %v410_v62 }
  0xf7   : > { %4599 = vst [vmem:[#allocation20_spill] sm:$0xff] %v2878_v12  ;;  %v468_v5 = vmul.f32 %v2878_v12, %v2878_v12  ;;  %v476_v38 = vmul.f32 %v2885_v0, %v2885_v0 }
  0xf8   : > { %4600 = vst [vmem:[#allocation21_spill] sm:$0xff] %v2885_v0 }
  0xf9   : > { %538 = vadd.xlane.f32.xlu1 %v485_v10  ;;  %504 = vadd.xlane.f32.xlu0 %v468_v5 }
  0xfa   : > { %502 = vadd.xlane.f32.xlu2 %v467_v63  ;;  %v371_v34 = vpop.xlane.xlu2 %370  ;;  %v373_v36 = vpop.xlane.xlu0 %372 }
  0xfb   : > { %v387_v35 = vpop.xlane.xlu1 %386  ;;  %v421_v17 = vmul.f32 %v2790_v39, %v371_v34  ;;  %v422_v51 = vmul.f32 %v2790_v39, %v373_v36 }
  0xfc   : > { %v429_v15 = vmul.f32 %v2790_v39, %v387_v35 }
  0xfd   : > { %v2892_v37 = vsub.f32 %v2731_v18, %v421_v17  ;;  %v2906_v18 = vsub.f32 %v2722_v16, %v409_v40  ;;  %v2925_v61 = vsub.f32 %v2737_v20, %v422_v51 }
  0xfe   : > { %v2903_v42 = vsub.f32 %v2734_v19, %v429_v15 }
  0xff   : > { %4602 = vst [vmem:[#allocation23_spill] sm:$0xff] %v2892_v37  ;;  %v487_v41 = vmul.f32 %v2892_v37, %v2892_v37  ;;  %v475_v19 = vmul.f32 %v2906_v18, %v2906_v18  ;;  %v488_v10 = vmul.f32 %v2925_v61, %v2925_v61 }
 0x100   : > { %4603 = vst [vmem:[#allocation24_spill] sm:$0xff] %v2903_v42  ;;  %v495_v49 = vmul.f32 %v2903_v42, %v2903_v42 }
 0x101   : > { %4604 = vst [vmem:[#allocation25_spill] sm:$0xff] %v2906_v18  ;;  %556 = vadd.xlane.f32.xlu1 %v494_v13  ;;  %542 = vadd.xlane.f32.xlu0 %v487_v41 }
 0x102   : > { %520 = vadd.xlane.f32.xlu2 %v476_v38  ;;  %v389_v43 = vpop.xlane.xlu2 %388  ;;  %v335_v47 = vpop.xlane.xlu0 %334  ;;  %4607 = vst [vmem:[#allocation28_spill] sm:$0xff] %v2925_v61 }
 0x103   : > { %v337_v45 = vpop.xlane.xlu1 %336  ;;  %v430_v46 = vmul.f32 %v2790_v39, %v389_v43  ;;  %v403_v2 = vmul.f32 %v2790_v39, %v335_v47 }
 0x104   : > { %v404_v50 = vmul.f32 %v2790_v39, %v337_v45 }
 0x105   : > { %v2910_v48 = vsub.f32 %v2743_v21, %v430_v46  ;;  %v2942_v34 = vsub.f32 %v2749_v23, %v403_v2  ;;  %v2021_v2 = vld [vmem:[#allocation7 + $0x38] sm:$0xff] }
 0x106   : > { %v2921_v11 = vsub.f32 %v2746_v22, %v404_v50  ;;  %2024 = vmatpush.bf16.msra.mxu2 %v2021_v2  ;;  %2025 = vmatpush.bf16.msra.mxu3 %v2021_v2 }
 0x107   : > { %4605 = vst [vmem:[#allocation26_spill] sm:$0xff] %v2910_v48  ;;  %v496_v16 = vmul.f32 %v2910_v48, %v2910_v48  ;;  %1687 = vmatpush.bf16.msra.mxu0 %v2021_v2  ;;  %2023 = vmatpush.bf16.msra.mxu1 %v2021_v2 }
 0x108   : > { %4606 = vst [vmem:[#allocation27_spill] sm:$0xff] %v2921_v11  ;;  %v470_v62 = vmul.f32 %v2921_v11, %v2921_v11 }
 0x109   : > { %518 = vadd.xlane.f32.xlu1 %v475_v19  ;;  %560 = vadd.xlane.f32.xlu0 %v496_v16  ;;  %4610 = vst [vmem:[#allocation31_spill] sm:$0xff] %v2942_v34 }
 0x10a   : > { %558 = vadd.xlane.f32.xlu2 %v495_v49  ;;  %v351_v21 = vpop.xlane.xlu2 %350  ;;  %v353_v59 = vpop.xlane.xlu0 %352 }
 0x10b   : > { %v377_v52 = vpop.xlane.xlu1 %376  ;;  %v411_v58 = vmul.f32 %v2790_v39, %v351_v21  ;;  %v412_v15 = vmul.f32 %v2790_v39, %v353_v59  ;;  %v2481_v59 = vmov 127.0  }
 0x10c   : > { %v424_v63 = vmul.f32 %v2790_v39, %v377_v52  ;;  %2122 = vrcp.f32 %v2481_v59 }
 0x10d   : > { %v2928_v14 = vsub.f32 %v2755_v24, %v411_v58  ;;  %v2960_v41 = vsub.f32 %v2761_v26, %v412_v15 }
 0x10e   : > { %v2939_v20 = vsub.f32 %v2758_v25, %v424_v63  ;;  %v469_v25 = vmul.f32 %v2942_v34, %v2942_v34 }
 0x10f   : > { %4608 = vst [vmem:[#allocation29_spill] sm:$0xff] %v2928_v14  ;;  %v477_v22 = vmul.f32 %v2928_v14, %v2928_v14  ;;  %v478_v49 = vmul.f32 %v2960_v41, %v2960_v41 }
 0x110   : > { %4609 = vst [vmem:[#allocation30_spill] sm:$0xff] %v2939_v20  ;;  %v490_v36 = vmul.f32 %v2939_v20, %v2939_v20 }
 0x111   : > { %522 = vadd.xlane.f32.xlu0 %v477_v22  ;;  %544 = vadd.xlane.f32.xlu1 %v488_v10  ;;  %4613 = vst [vmem:[#allocation34_spill] sm:$0xff] %v2960_v41 }
 0x112   : > { %508 = vadd.xlane.f32.xlu2 %v470_v62  ;;  %v375_v24 = vpop.xlane.xlu0 %374  ;;  %v391_v23 = vpop.xlane.xlu2 %390 }
 0x113   : > { %v341_v5 = vpop.xlane.xlu1 %340  ;;  %v423_v35 = vmul.f32 %v2790_v39, %v375_v24  ;;  %v431_v47 = vmul.f32 %v2790_v39, %v391_v23 }
 0x114   : > { %v406_v38 = vmul.f32 %v2790_v39, %v341_v5 }
 0x115   : > { %v2946_v17 = vsub.f32 %v2773_v29, %v423_v35  ;;  %v2974_v26 = vsub.f32 %v2770_v28, %v431_v47 }
 0x116   : > { %v2957_v13 = vsub.f32 %v2767_v27, %v406_v38 }
 0x117   : > { %4611 = vst [vmem:[#allocation32_spill] sm:$0xff] %v2946_v17  ;;  %v489_v40 = vmul.f32 %v2946_v17, %v2946_v17  ;;  %v497_v51 = vmul.f32 %v2974_v26, %v2974_v26 }
 0x118   : > { %4612 = vst [vmem:[#allocation33_spill] sm:$0xff] %v2957_v13  ;;  %v472_v46 = vmul.f32 %v2957_v13, %v2957_v13 }
 0x119   : > { %548 = vadd.xlane.f32.xlu0 %v490_v36  ;;  %506 = vadd.xlane.f32.xlu1 %v469_v25  ;;  %4615 = vst [vmem:[#allocation36_spill] sm:$0xff] %v2974_v26  ;;  %v2019_v36 = vld [vmem:[#allocation7 + $0x28] sm:$0xff]  ;;  %v2018_v25 = vld [vmem:[#allocation7 + $0x20] sm:$0xff] }
 0x11a   : > { %546 = vadd.xlane.f32.xlu2 %v489_v40  ;;  %v339_v29 = vpop.xlane.xlu0 %338 }
 0x11b   : > { %v405_v43 = vmul.f32 %v2790_v39, %v339_v29 }
 0x11d   : > { %v2964_v45 = vsub.f32 %v2782_v31, %v405_v43  ;;  %v355_v31 = vpop.xlane.xlu2 %354  ;;  %v2017_v43 = vld [vmem:[#allocation7 + $0x18] sm:$0xff] }
 0x11e   : > { %v413_v21 = vmul.f32 %v2790_v39, %v355_v31 }
 0x11f   : > { %4614 = vst [vmem:[#allocation35_spill] sm:$0xff] %v2964_v45  ;;  %v471_v27 = vmul.f32 %v2964_v45, %v2964_v45 }
 0x120   : > { %v2986_v28 = vsub.f32 %v2779_v30, %v413_v21  ;;  %v2020_v30 = vld [vmem:[#allocation7 + $0x30] sm:$0xff] }
 0x121   : > { %512 = vadd.xlane.f32.xlu0 %v472_v46  ;;  %524 = vadd.xlane.f32.xlu1 %v478_v49 }
 0x122   : > { %510 = vadd.xlane.f32.xlu2 %v471_v27  ;;  %v357_v50 = vpop.xlane.xlu0 %356  ;;  %4617 = vst [vmem:[#allocation38_spill] sm:$0xff] %v2986_v28  ;;  %v479_v58 = vmul.f32 %v2986_v28, %v2986_v28  ;;  %2027 = vmatpush.bf16.msra.mxu2 %v2020_v30 }
 0x123   : > { %v414_v19 = vmul.f32 %v2790_v39, %v357_v50  ;;  %2028 = vmatpush.bf16.msra.mxu3 %v2020_v30  ;;  %1688 = vmatpush.bf16.msra.mxu0 %v2020_v30  ;;  %v2016_v50 = vld [vmem:[#allocation7 + $0x10] sm:$0xff] }
 0x124   : > { %2026 = vmatpush.bf16.msra.mxu1 %v2020_v30 }
 0x125   : > { %v2978_v16 = vsub.f32 %v2787_v32, %v414_v19  ;;  %v2123_v32 = vpop.eup %2122 }
 0x126   : > { %v565_v62 = vmul.f32 127.0, %v2123_v32  ;;  %vm569_vm1 = vweird.f32 %v2123_v32  ;;  %2030 = vmatpush.bf16.msra.mxu2 %v2019_v36 }
 0x127   : > { %4616 = vst [vmem:[#allocation37_spill] sm:$0xff] %v2978_v16  ;;  %v480_v52 = vmul.f32 %v2978_v16, %v2978_v16  ;;  %2031 = vmatpush.bf16.msra.mxu3 %v2019_v36  ;;  %1689 = vmatpush.bf16.msra.mxu0 %v2019_v36 }
 0x128   : > { %v566_v63 = vsub.f32 1.0, %v565_v62  ;;  %2029 = vmatpush.bf16.msra.mxu1 %v2019_v36  ;;  %v2014_v36 = vld [vmem:[#allocation7] sm:$0xff] }
 0x129   : > { %562 = vadd.xlane.f32.xlu1 %v497_v51 }
 0x12a   : > { %528 = vadd.xlane.f32.xlu2 %v480_v52  ;;  %v567_v22 = vmul.f32 %v2123_v32, %v566_v63  ;;  %2033 = vmatpush.bf16.msra.mxu2 %v2018_v25  ;;  %v2015_v63 = vld [vmem:[#allocation7 + $0x8] sm:$0xff] }
 0x12b   : > { %2034 = vmatpush.bf16.msra.mxu3 %v2018_v25  ;;  %1690 = vmatpush.bf16.msra.mxu0 %v2018_v25 }
 0x12c   : > { %v568_v39 = vadd.f32 %v2123_v32, %v567_v22  ;;  %2032 = vmatpush.bf16.msra.mxu1 %v2018_v25 }
 0x12e   : > { %v2990_v10 = vsel %vm569_vm1, %v2123_v32, %v568_v39  ;;  %2036 = vmatpush.bf16.msra.mxu2 %v2017_v43 }
 0x12f   : > { %2037 = vmatpush.bf16.msra.mxu3 %v2017_v43  ;;  %1691 = vmatpush.bf16.msra.mxu0 %v2017_v43 }
 0x130   : > { %2035 = vmatpush.bf16.msra.mxu1 %v2017_v43 }
 0x131   : > { %526 = vadd.xlane.f32.xlu1 %v479_v58 }
 0x132   : > { %2039 = vmatpush.bf16.msra.mxu2 %v2016_v50 }
 0x133   : > { %2040 = vmatpush.bf16.msra.mxu3 %v2016_v50  ;;  %1692 = vmatpush.bf16.msra.mxu0 %v2016_v50 }
 0x134   : > { %2038 = vmatpush.bf16.msra.mxu1 %v2016_v50 }
 0x136   : > { %2042 = vmatpush.bf16.msra.mxu2 %v2015_v63 }
 0x137   : > { %2043 = vmatpush.bf16.msra.mxu3 %v2015_v63  ;;  %1693 = vmatpush.bf16.msra.mxu0 %v2015_v63 }
 0x138   : > { %2041 = vmatpush.bf16.msra.mxu1 %v2015_v63 }
 0x13a   : > { %2045 = vmatpush.bf16.msra.mxu2 %v2014_v36 }
 0x13b   : > { %2046 = vmatpush.bf16.msra.mxu3 %v2014_v36  ;;  %1694 = vmatpush.bf16.msra.mxu0 %v2014_v36 }
 0x13c   : > { %2044 = vmatpush.bf16.msra.mxu1 %v2014_v36 }
 0x144   : > { %v531_v24 = vpop.xlane.xlu0 %530 }
 0x145   : > { %v2993_v5 = vmul.f32 %v2990_v10, %v531_v24 }
 0x147   : > { %2124 = vrsqrt.f32 %v2993_v5  ;;  %vm803_vm2 = vcmp.eq.f32.partialorder %v2993_v5, inf  ;;  %vm805_vm3 = vcmp.eq.f32.partialorder %v2993_v5, 0.0  ;;  %v806_v28 = vand.u32 2147483648, %v2993_v5 }
 0x14c   : > { %v533_v38 = vpop.xlane.xlu1 %532  ;;  %v553_v23 = vpop.xlane.xlu0 %552 }
 0x14d   : > { %v537_v35 = vpop.xlane.xlu2 %536  ;;  %v2997_v15 = vmul.f32 %v2990_v10, %v533_v38  ;;  %v2125_v46 = vpop.eup %2124  ;;  %v3005_v49 = vmul.f32 %v2990_v10, %v553_v23 }
 0x14e   : > { %v3000_v40 = vmul.f32 %v2990_v10, %v537_v35  ;;  %v797_v27 = vmul.f32 %v2125_v46, %v2993_v5 }
 0x14f   : > { %2126 = vrsqrt.f32 %v2997_v15  ;;  %vm815_vm5 = vcmp.eq.f32.partialorder %v2997_v15, inf  ;;  %vm817_vm6 = vcmp.eq.f32.partialorder %v2997_v15, 0.0  ;;  %vm935_vm7 = vcmp.eq.f32.partialorder %v3005_v49, inf }
 0x150   : > { %2128 = vrsqrt.f32 %v3000_v40  ;;  %v798_v21 = vmul.f32 %v2125_v46, %v797_v27  ;;  %vm839_vm4 = vcmp.eq.f32.partialorder %v3000_v40, inf }
 0x151   : > { %2130 = vrsqrt.f32 %v3005_v49 }
 0x152   : > { %v799_v30 = vmul.f32 0.5, %v798_v21 }
 0x154   : > { %v535_v47 = vpop.xlane.xlu1 %534  ;;  %v515_v58 = vpop.xlane.xlu0 %514  ;;  %v800_v23 = vsub.f32 1.5, %v799_v30 }
 0x155   : > { %v551_v29 = vpop.xlane.xlu2 %550  ;;  %v3008_v31 = vpop.eup %2126  ;;  %v3017_v52 = vmul.f32 %v2990_v10, %v535_v47  ;;  %v3025_v2 = vmul.f32 %v2990_v10, %v515_v58 }
 0x156   : > { %v3012_v19 = vmul.f32 %v2990_v10, %v551_v29  ;;  %v3014_v51 = vpop.eup %2128  ;;  %v809_v32 = vmul.f32 %v3008_v31, %v2997_v15 }
 0x157   : > { %v833_v22 = vmul.f32 %v3014_v51, %v3000_v40  ;;  %v3027_v39 = vpop.eup %2130  ;;  %vm827_vm9 = vcmp.eq.f32.partialorder %v3017_v52, inf  ;;  %vm707_vm10 = vcmp.eq.f32.partialorder %v3025_v2, inf }
 0x158   : > { %2132 = vrsqrt.f32 %v3012_v19  ;;  %v810_v24 = vmul.f32 %v3008_v31, %v809_v32  ;;  %v929_v25 = vmul.f32 %v3027_v39, %v3005_v49  ;;  %vm923_vm8 = vcmp.eq.f32.partialorder %v3012_v19, inf }
 0x159   : > { %2134 = vrsqrt.f32 %v3017_v52  ;;  %v834_v38 = vmul.f32 %v3014_v51, %v833_v22  ;;  %v801_v22 = vmul.f32 %v2125_v46, %v800_v23 }
 0x15a   : > { %2136 = vrsqrt.f32 %v3025_v2  ;;  %v811_v47 = vmul.f32 0.5, %v810_v24  ;;  %v930_v32 = vmul.f32 %v3027_v39, %v929_v25 }
 0x15b   : > { %v802_v23 = vmul.f32 %v801_v22, %v2993_v5 }
 0x15c   : > { %v499_v62 = vpop.xlane.xlu1 %498  ;;  %v812_v16 = vsub.f32 1.5, %v811_v47  ;;  %v931_v25 = vmul.f32 0.5, %v930_v32 }
 0x15d   : > { %v501_v59 = vpop.xlane.xlu2 %500  ;;  %v3042_v27 = vmul.f32 %v2990_v10, %v499_v62  ;;  %v804_v22 = vsel %vm803_vm2, %v2993_v5, %v802_v23  ;;  %vm937_vm2 = vcmp.eq.f32.partialorder %v3005_v49, 0.0 }
 0x15e   : > { %v3032_v35 = vmul.f32 %v2990_v10, %v501_v59  ;;  %v3038_v43 = vpop.eup %2132  ;;  %v835_v59 = vmul.f32 0.5, %v834_v38  ;;  %v813_v26 = vmul.f32 %v3008_v31, %v812_v16  ;;  %v932_v31 = vsub.f32 1.5, %v931_v25 }
 0x15f   : > { %v3044_v58 = vpop.eup %2134  ;;  %v917_v30 = vmul.f32 %v3038_v43, %v3012_v19  ;;  %v807_v61 = vsel %vm805_vm3, %v806_v28, %v804_v22  ;;  %vm611_vm12 = vcmp.eq.f32.partialorder %v3042_v27, inf  ;;  %vm925_vm3 = vcmp.eq.f32.partialorder %v3012_v19, 0.0 }
 0x160   : > { %2138 = vrsqrt.f32 %v3032_v35  ;;  %v3055_v62 = vpop.eup %2136  ;;  %v821_v36 = vmul.f32 %v3044_v58, %v3017_v52  ;;  %v836_v46 = vsub.f32 1.5, %v835_v59  ;;  %vm623_vm11 = vcmp.eq.f32.partialorder %v3032_v35, inf }
 0x161   : > { %2140 = vrsqrt.f32 %v3042_v27  ;;  %v701_v47 = vmul.f32 %v3055_v62, %v3025_v2 }
 0x162   : > { %v822_v13 = vmul.f32 %v3044_v58, %v821_v36  ;;  %v837_v16 = vmul.f32 %v3014_v51, %v836_v46  ;;  %v814_v51 = vmul.f32 %v813_v26, %v2997_v15  ;;  %v933_v26 = vmul.f32 %v3027_v39, %v932_v31 }
 0x163   : > { %v702_v11 = vmul.f32 %v3055_v62, %v701_v47 }
 0x164   : > { %v517_v50 = vpop.xlane.xlu1 %516  ;;  %v555_v21 = vpop.xlane.xlu0 %554  ;;  %v823_v46 = vmul.f32 0.5, %v822_v13  ;;  %v838_v13 = vmul.f32 %v837_v16, %v3000_v40 }
 0x165   : > { %v541_v29 = vpop.xlane.xlu2 %540  ;;  %v3053_v24 = vmul.f32 %v2990_v10, %v517_v50  ;;  %v3074_v59 = vmul.f32 %v2990_v10, %v555_v21  ;;  %v703_v48 = vmul.f32 0.5, %v702_v11 }
 0x166   : > { %v3048_v63 = vmul.f32 %v2990_v10, %v541_v29  ;;  %v3061_v38 = vpop.eup %2138  ;;  %v918_v29 = vmul.f32 %v3038_v43, %v917_v30  ;;  %v818_v30 = vand.u32 2147483648, %v2997_v15  ;;  %v824_v16 = vsub.f32 1.5, %v823_v46 }
 0x167   : > { %4619 = vst [vmem:[#allocation40_spill] sm:$0xff] %v3074_v59  ;;  %v617_v20 = vmul.f32 %v3061_v38, %v3032_v35  ;;  %v3082_v17 = vpop.eup %2140  ;;  %v3136_v22 = vsel %vm839_vm4, %v3000_v40, %v838_v13  ;;  %vm719_vm14 = vcmp.eq.f32.partialorder %v3053_v24, inf  ;;  %vm947_vm15 = vcmp.eq.f32.partialorder %v3074_v59, inf }
 0x168   : > { %4618 = vst [vmem:[#allocation39_spill] sm:$0xff] %v3048_v63  ;;  %2142 = vrsqrt.f32 %v3048_v63  ;;  %v919_v41 = vmul.f32 0.5, %v918_v29  ;;  %v605_v29 = vmul.f32 %v3082_v17, %v3042_v27  ;;  %vm863_vm13 = vcmp.eq.f32.partialorder %v3048_v63, inf }
 0x169   : > { %2144 = vrsqrt.f32 %v3053_v24  ;;  %v618_v23 = vmul.f32 %v3061_v38, %v617_v20 }
 0x16a   : > { %2146 = vrsqrt.f32 %v3074_v59  ;;  %v920_v14 = vsub.f32 1.5, %v919_v41  ;;  %v606_v11 = vmul.f32 %v3082_v17, %v605_v29 }
 0x16b   : > { %v619_v41 = vmul.f32 0.5, %v618_v23  ;;  %v3141_v23 = vadd.f32 1e-06, %v807_v61 }
 0x16c   : > { %v539_v32 = vpop.xlane.xlu1 %538  ;;  %v505_v45 = vpop.xlane.xlu0 %504 }
 0x16d   : > { %v503_v50 = vpop.xlane.xlu2 %502  ;;  %v3100_v25 = vmul.f32 %v2990_v10, %v539_v32  ;;  %v3110_v47 = vmul.f32 %v2990_v10, %v505_v45  ;;  %v816_v45 = vsel %vm815_vm5, %v2997_v15, %v814_v51  ;;  %v934_v51 = vmul.f32 %v933_v26, %v3005_v49 }
 0x16e   : > { %v3087_v36 = vmul.f32 %v2990_v10, %v503_v50  ;;  %v3095_v34 = vpop.eup %2142  ;;  %v704_v32 = vsub.f32 1.5, %v703_v48  ;;  %v819_v61 = vsel %vm817_vm6, %v818_v30, %v816_v45  ;;  %v620_v48 = vsub.f32 1.5, %v619_v41 }
 0x16f   : > { %v3102_v50 = vpop.eup %2144  ;;  %v857_v20 = vmul.f32 %v3095_v34, %v3048_v63  ;;  %v3180_v46 = vadd.f32 1e-06, %v819_v61  ;;  %vm1262_vm1 = vweird.f32 %v3141_v23 }
 0x170   : > { %2148 = vrsqrt.f32 %v3087_v36  ;;  %v713_v39 = vmul.f32 %v3102_v50, %v3053_v24  ;;  %v3131_v5 = vpop.eup %2146  ;;  %v705_v45 = vmul.f32 %v3055_v62, %v704_v32  ;;  %v621_v18 = vmul.f32 %v3061_v38, %v620_v48 }
 0x171   : > { %2150 = vrsqrt.f32 %v3100_v25  ;;  %v858_v37 = vmul.f32 %v3095_v34, %v857_v20  ;;  %v941_v20 = vmul.f32 %v3131_v5, %v3074_v59  ;;  %vm635_vm0 = vcmp.eq.f32.partialorder %v3087_v36, inf }
 0x172   : > { %2152 = vrsqrt.f32 %v3110_v47  ;;  %v714_v13 = vmul.f32 %v3102_v50, %v713_v39  ;;  %v3166_v39 = vsel %vm935_vm7, %v3005_v49, %v934_v51  ;;  %v706_v48 = vmul.f32 %v705_v45, %v3025_v2 }
 0x173   : > { %v942_v62 = vmul.f32 %v3131_v5, %v941_v20  ;;  %v622_v9 = vmul.f32 %v621_v18, %v3032_v35  ;;  %vm851_vm7 = vcmp.eq.f32.partialorder %v3100_v25, inf }
 0x174   : > { %v557_v31 = vpop.xlane.xlu1 %556  ;;  %v543_v28 = vpop.xlane.xlu0 %542  ;;  %v715_v51 = vmul.f32 0.5, %v714_v13 }
 0x175   : > { %v521_v42 = vpop.xlane.xlu2 %520  ;;  %v3148_v0 = vmul.f32 %v2990_v10, %v557_v31  ;;  %v3154_v26 = vmul.f32 %v2990_v10, %v543_v28  ;;  %v943_v7 = vmul.f32 0.5, %v942_v62 }
 0x176   : > { %v3129_v21 = vmul.f32 %v2990_v10, %v521_v42  ;;  %v3143_v29 = vpop.eup %2148  ;;  %v921_v42 = vmul.f32 %v3038_v43, %v920_v14  ;;  %v825_v14 = vmul.f32 %v3044_v58, %v824_v16  ;;  %v607_v43 = vmul.f32 0.5, %v606_v11 }
 0x177   : > { %v3161_v31 = vpop.eup %2150  ;;  %v629_v15 = vmul.f32 %v3143_v29, %v3087_v36  ;;  %v859_v16 = vmul.f32 0.5, %v858_v37  ;;  %v716_v11 = vsub.f32 1.5, %v715_v51 }
 0x178   : > { %2154 = vrsqrt.f32 %v3129_v21  ;;  %v3173_v58 = vpop.eup %2152  ;;  %v922_v30 = vmul.f32 %v921_v42, %v3012_v19  ;;  %v826_v28 = vmul.f32 %v825_v14, %v3017_v52  ;;  %v608_v42 = vsub.f32 1.5, %v607_v43 }
 0x179   : > { %2156 = vrcp.f32 %v3141_v23  ;;  %v630_v33 = vmul.f32 %v3143_v29, %v629_v15  ;;  %v845_v13 = vmul.f32 %v3161_v31, %v3100_v25  ;;  %v641_v61 = vmul.f32 %v3173_v58, %v3110_v47 }
 0x17a   : > { %2158 = vrsqrt.f32 %v3148_v0  ;;  %v3199_v38 = vsel %vm923_vm8, %v3012_v19, %v922_v30  ;;  %v860_v43 = vsub.f32 1.5, %v859_v16  ;;  %v3217_v45 = vsel %vm827_vm9, %v3017_v52, %v826_v28 }
 0x17b   : > { %2160 = vrsqrt.f32 %v3154_v26  ;;  %v609_v16 = vmul.f32 %v3082_v17, %v608_v42  ;;  %v846_v12 = vmul.f32 %v3161_v31, %v845_v13  ;;  %v642_v56 = vmul.f32 %v3173_v58, %v641_v61 }
 0x17c   : > { %v519_v37 = vpop.xlane.xlu1 %518  ;;  %v561_v8 = vpop.xlane.xlu0 %560  ;;  %v3230_v28 = vsel %vm707_vm10, %v3025_v2, %v706_v48  ;;  %v861_v17 = vmul.f32 %v3095_v34, %v860_v43  ;;  %v944_v34 = vsub.f32 1.5, %v943_v7  ;;  %vm647_vm8 = vcmp.eq.f32.partialorder %v3110_v47, inf }
 0x17d   : > { %v559_v41 = vpop.xlane.xlu2 %558  ;;  %4621 = vst [vmem:[#allocation42_spill] sm:$0xff] %v3230_v28  ;;  %v610_v61 = vmul.f32 %v609_v16, %v3042_v27  ;;  %v3246_v43 = vmul.f32 %v2990_v10, %v561_v8  ;;  %v847_v57 = vmul.f32 0.5, %v846_v12  ;;  %v643_v4 = vmul.f32 0.5, %v642_v56 }
 0x17e   : > { %v3186_v32 = vpop.eup %2154  ;;  %v3194_v14 = vmul.f32 %v2990_v10, %v559_v41  ;;  %v3210_v41 = vmul.f32 %v2990_v10, %v519_v37  ;;  %v631_v37 = vmul.f32 0.5, %v630_v33  ;;  %v717_v33 = vmul.f32 %v3102_v50, %v716_v11 }
 0x17f   : > { %v737_v20 = vmul.f32 %v3186_v32, %v3129_v21  ;;  %v3204_v15 = vpop.eup %2156  ;;  %v3253_v50 = vsel %vm623_vm11, %v3032_v35, %v622_v9  ;;  %v862_v54 = vmul.f32 %v861_v17, %v3048_v63  ;;  %v3265_v9 = vsel %vm611_vm12, %v3042_v27, %v610_v61 }
 0x180   : > { %4620 = vst [vmem:[#allocation41_spill] sm:$0xff] %v3194_v14  ;;  %2162 = vrsqrt.f32 %v3194_v14  ;;  %v3212_v30 = vpop.eup %2158  ;;  %v1258_v18 = vmul.f32 %v3204_v15, %v3141_v23  ;;  %v632_v11 = vsub.f32 1.5, %v631_v37  ;;  %v718_v48 = vmul.f32 %v717_v33, %v3053_v24 }
 0x181   : > { %v3221_v51 = vpop.eup %2160  ;;  %v738_v42 = vmul.f32 %v3186_v32, %v737_v20  ;;  %v953_v62 = vmul.f32 %v3212_v30, %v3148_v0  ;;  %2164 = vrsqrt.f32 %v3210_v41  ;;  %v945_v56 = vmul.f32 %v3131_v5, %v944_v34 }
 0x182   : > { %v869_v13 = vmul.f32 %v3221_v51, %v3154_v26  ;;  %v1259_v3 = vsub.f32 1.0, %v1258_v18  ;;  %2166 = vrsqrt.f32 %v3246_v43  ;;  %v848_v18 = vsub.f32 1.5, %v847_v57 }
 0x183   : > { %v739_v7 = vmul.f32 0.5, %v738_v42  ;;  %v954_v8 = vmul.f32 %v3212_v30, %v953_v62  ;;  %v633_v42 = vmul.f32 %v3143_v29, %v632_v11  ;;  %v644_v33 = vsub.f32 1.5, %v643_v4 }
 0x184   : > { %v870_v28 = vmul.f32 %v3221_v51, %v869_v13  ;;  %v3279_v62 = vsel %vm863_vm13, %v3048_v63, %v862_v54  ;;  %v1260_v61 = vmul.f32 %v3204_v15, %v1259_v3  ;;  %v3286_v34 = vsel %vm719_vm14, %v3053_v24, %v718_v48  ;;  %v545_v12 = vpop.xlane.xlu1 %544 }
 0x185   : > { %4622 = vst [vmem:[#allocation43_spill] sm:$0xff] %v3279_v62  ;;  %v740_v5 = vsub.f32 1.5, %v739_v7  ;;  %v955_v29 = vmul.f32 0.5, %v954_v8  ;;  %v946_v11 = vmul.f32 %v945_v56, %v3074_v59  ;;  %2168 = vrcp.f32 %v3180_v46  ;;  %v509_v7 = vpop.xlane.xlu2 %508 }
 0x186   : > { %v3248_v20 = vpop.eup %2162  ;;  %v871_v57 = vmul.f32 0.5, %v870_v28  ;;  %v634_v48 = vmul.f32 %v633_v42, %v3087_v36  ;;  %v849_v28 = vmul.f32 %v3161_v31, %v848_v18  ;;  %v645_v8 = vmul.f32 %v3173_v58, %v644_v33 }
 0x187   : > { %v965_v37 = vmul.f32 %v3248_v20, %v3194_v14  ;;  %v3272_v17 = vpop.eup %2164  ;;  %v1261_v4 = vadd.f32 %v3204_v15, %v1260_v61  ;;  %vm1263_vm4 = vweird.f32 %v3204_v15  ;;  %v956_v62 = vsub.f32 1.5, %v955_v29 }
 0x188   : > { %v725_v54 = vmul.f32 %v3272_v17, %v3210_v41  ;;  %v3294_v3 = vpop.eup %2166  ;;  %v872_v63 = vsub.f32 1.5, %v871_v57  ;;  %v1268_v42 = vand.u32 2147483648, %v3141_v23  ;;  %v3309_v31 = vmul.f32 %v2990_v10, %v509_v7  ;;  %vm3329_vm5 = vmor %vm1262_vm1, %vm1263_vm4  ;;  %v3379_v57 = vld [vmem:[#allocation5] ss:$0 sm:$0xff] }
 0x189   : > { %v966_v16 = vmul.f32 %v3248_v20, %v965_v37  ;;  %v741_v37 = vmul.f32 %v3186_v32, %v740_v5  ;;  %v977_v13 = vmul.f32 %v3294_v3, %v3246_v43  ;;  %v3314_v58 = vsel %vm947_vm15, %v3074_v59, %v946_v11 }
 0x18a   : > { %4623 = vst [vmem:[#allocation44_spill] sm:$0xff] %v3314_v58  ;;  %v726_v18 = vmul.f32 %v3272_v17, %v725_v54  ;;  %v1266_v33 = vand.u32 2147483647, %v3141_v23  ;;  %v3321_v5 = vsel %vm635_vm0, %v3087_v36, %v634_v48  ;;  %v3324_v61 = vmul.f32 %v849_v28, %v3100_v25  ;;  %v523_v23 = vpop.xlane.xlu0 %522 }
 0x18b   : > { %v967_v32 = vmul.f32 0.5, %v966_v16  ;;  %2170 = vrsqrt.f32 %v3309_v31  ;;  %v2169_v16 = vpop.eup %2168  ;;  %v3335_v11 = vmul.f32 %v645_v8, %v3110_v47  ;;  %v3338_v54 = vmul.f32 %v741_v37, %v3129_v21 }
 0x18c   : > { %v978_v7 = vmul.f32 %v3294_v3, %v977_v13  ;;  %v1265_v48 = vsel %vm3329_vm5, %v3204_v15, %v1261_v4  ;;  %v957_v28 = vmul.f32 %v3212_v30, %v956_v62  ;;  %v873_v29 = vmul.f32 %v3221_v51, %v872_v63 }
 0x18d   : > { %v1269_v56 = vor.u32 1.1754944e-38, %v1268_v42  ;;  %v1272_v58 = vmul.f32 %v2169_v16, %v3180_v46  ;;  %v968_v59 = vsub.f32 1.5, %v967_v32  ;;  %v727_v8 = vmul.f32 0.5, %v726_v18 }
 0x18e   : > { %vm1267_vm6 = vcmp.eq.f32.partialorder %v1266_v33, 8.507059e+37  ;;  %v3348_v37 = vmul.f32 %v2990_v10, %v545_v12  ;;  %vm1276_vm9 = vweird.f32 %v3180_v46  ;;  %v3354_v30 = vmul.f32 %v2990_v10, %v523_v23 }
 0x18f   : > { %v1270_v13 = vsel %vm1267_vm6, %v1269_v56, %v1265_v48  ;;  %v1273_v15 = vsub.f32 1.0, %v1272_v58  ;;  %vm743_vm10 = vcmp.eq.f32.partialorder %v3129_v21, inf  ;;  %vm959_vm11 = vcmp.eq.f32.partialorder %v3148_v0, inf }
 0x190   : > { %v979_v63 = vmul.f32 0.5, %v978_v7  ;;  %v1282_v51 = vand.u32 2147483648, %v3180_v46  ;;  %v4626_v12 = vand.u32 2147483648, %v3012_v19  ;;  %v4627_v4 = vand.u32 2147483648, %v3005_v49 }
 0x191   : > { %v3369_v42 = vpop.eup %2170  ;;  %vm875_vm12 = vcmp.eq.f32.partialorder %v3154_v26, inf  ;;  %vm971_vm13 = vcmp.eq.f32.partialorder %v3194_v14, inf  ;;  %v1274_v58 = vmul.f32 %v2169_v16, %v1273_v15  ;;  %vm1277_vm14 = vweird.f32 %v2169_v16 }
 0x192   : > { %v927_v62 = vsel %vm925_vm3, %v4626_v12, %v3199_v38  ;;  %v939_v56 = vsel %vm937_vm2, %v4627_v4, %v3166_v39  ;;  %v1280_v32 = vand.u32 2147483647, %v3180_v46  ;;  %2172 = vrsqrt.f32 %v3348_v37  ;;  %v507_v39 = vpop.xlane.xlu1 %506  ;;  %vm1278_vm15 = vmor %vm1276_vm9, %vm1277_vm14 }
 0x193   : > { %v969_v19 = vmul.f32 %v3248_v20, %v968_v59  ;;  %v728_v38 = vsub.f32 1.5, %v727_v8  ;;  %v1512_v18 = vmul.f32 %v1270_v13, %v2794_v44  ;;  %v665_v49 = vmul.f32 %v3369_v42, %v3309_v31 }
 0x194   : > { %v1275_v33 = vadd.f32 %v2169_v16, %v1274_v58  ;;  %2174 = vrsqrt.f32 %v3354_v30  ;;  %v3382_v7 = vadd.f32 1e-06, %v927_v62  ;;  %v3384_v48 = vadd.f32 1e-06, %v939_v56  ;;  %v3407_v62 = vld [vmem:[%s4540_s2] ss:$0 sm:$0xff]  ;;  %v547_v58 = vpop.xlane.xlu2 %546 }
 0x195   : > { %v958_v23 = vmul.f32 %v957_v28, %v3148_v0  ;;  %v874_v59 = vmul.f32 %v873_v29, %v3154_v26  ;;  %v980_v20 = vsub.f32 1.5, %v979_v63  ;;  %v1283_v44 = vor.u32 1.1754944e-38, %v1282_v51 }
 0x196   : > { %v1279_v8 = vsel %vm1278_vm15, %v2169_v16, %v1275_v33  ;;  %vm1281_vm0 = vcmp.eq.f32.partialorder %v1280_v32, 8.507059e+37  ;;  %2176 = vrcp.f32 %v3382_v7  ;;  %v3393_v13 = vmul.f32 %v2990_v10, %v507_v39 }
 0x197   : > { %v970_v15 = vmul.f32 %v969_v19, %v3194_v14  ;;  %v1284_v12 = vsel %vm1281_vm0, %v1283_v44, %v1279_v8  ;;  %v666_v28 = vmul.f32 %v3369_v42, %v665_v49  ;;  %2178 = vrcp.f32 %v3384_v48 }
 0x198   : > { %v3398_v29 = vpop.eup %2172  ;;  %v729_v46 = vmul.f32 %v3272_v17, %v728_v38  ;;  %v1513_v16 = vmul.f32 %v1284_v12, %v2809_v55  ;;  %v1548_v51 = vmul.f32 %v3379_v57, %v1512_v18  ;;  %v3413_v4 = vsel %vm851_vm7, %v3100_v25, %v3324_v61 }
 0x199   : > { %v3419_v17 = vsel %vm647_vm8, %v3110_v47, %v3335_v11  ;;  %v981_v55 = vmul.f32 %v3294_v3, %v980_v20  ;;  %v3429_v19 = vsel %vm743_vm10, %v3129_v21, %v3338_v54  ;;  %v3434_v61 = vsel %vm959_vm11, %v3148_v0, %v958_v23  ;;  %v549_v3 = vpop.xlane.xlu0 %548 }
 0x19a   : > { %v3423_v32 = vpop.eup %2174  ;;  %v1549_v11 = vmul.f32 %v3379_v57, %v1513_v16  ;;  %2180 = vrsqrt.f32 %v3393_v13  ;;  %v3441_v38 = vsel %vm875_vm12, %v3154_v26, %v874_v59  ;;  %v3446_v54 = vsel %vm971_vm13, %v3194_v14, %v970_v15 }
 0x19b   : > { %4628 = vst [vmem:[#allocation45_spill] sm:$0xff] %v3441_v38  ;;  %v667_v18 = vmul.f32 0.5, %v666_v28  ;;  %v881_v49 = vmul.f32 %v3398_v29, %v3348_v37  ;;  %vm613_vm1 = vcmp.eq.f32.partialorder %v3042_v27, 0.0  ;;  %v3452_v33 = vmul.f32 %v729_v46, %v3210_v41 }
 0x19c   : > { %4629 = vst [vmem:[#allocation46_spill] sm:$0xff] %v3446_v54  ;;  %v2177_v39 = vpop.eup %2176  ;;  %v1585_v23 = vadd.f32 %v3407_v62, %v1548_v51  ;;  %v1586_v59 = vadd.f32 %v3407_v62, %v1549_v11  ;;  %v3457_v20 = vmul.f32 %v2990_v10, %v547_v58  ;;  %vm625_vm2 = vcmp.eq.f32.partialorder %v3032_v35, 0.0 }
 0x19d   : > { %v2179_v44 = vpop.eup %2178  ;;  %v3461_v8 = vmul.f32 %v981_v55, %v3246_v43  ;;  %v749_v15 = vmul.f32 %v3423_v32, %v3354_v30  ;;  %v1398_v12 = vmul.f32 %v2177_v39, %v3382_v7  ;;  %v3467_v28 = vmul.f32 %v2990_v10, %v549_v3 }
 0x19e   : > { %v1610_v46 = vpack.c.bf16 %v1586_v59, %v1585_v23  ;;  %vm1402_vm3 = vweird.f32 %v3382_v7  ;;  %v1406_v16 = vand.u32 2147483647, %v3382_v7  ;;  %v1412_v51 = vmul.f32 %v2179_v44, %v3384_v48 }
 0x19f   : > { %v668_v58 = vsub.f32 1.5, %v667_v18  ;;  %v882_v11 = vmul.f32 %v3398_v29, %v881_v49  ;;  %v1399_v55 = vsub.f32 1.0, %v1398_v12  ;;  %v1408_v56 = vand.u32 2147483648, %v3382_v7 }
 0x1a0   : > { %v3474_v63 = vpop.eup %2180  ;;  %1735 = vmatmul.bf16.vlgmr.msra.gmra.mxu2 %v1610_v46  ;;  %v1413_v54 = vsub.f32 1.0, %v1412_v51  ;;  %v1420_v3 = vand.u32 2147483647, %v3384_v48  ;;  %v1422_v23 = vand.u32 2147483648, %v3384_v48  ;;  %2182 = vrsqrt.f32 %v3457_v20 }
 0x1a1   : > { %v750_v59 = vmul.f32 %v3423_v32, %v749_v15  ;;  %v1400_v14 = vmul.f32 %v2177_v39, %v1399_v55  ;;  %vm1403_vm4 = vweird.f32 %v2177_v39  ;;  %v653_v18 = vmul.f32 %v3474_v63, %v3393_v13 }
 0x1a2   : > { %vm731_vm5 = vcmp.eq.f32.partialorder %v3210_v41, inf  ;;  %vm3483_vm6 = vcmp.eq.f32.partialorder %v1406_v16, 8.507059e+37  ;;  %v1414_v12 = vmul.f32 %v2179_v44, %v1413_v54  ;;  %vm1417_vm7 = vweird.f32 %v2179_v44  ;;  %vm1404_vm11 = vmor %vm1402_vm3, %vm1403_vm4 }
 0x1a3   : > { %2184 = vrsqrt.f32 %v3467_v28  ;;  %v883_v46 = vmul.f32 0.5, %v882_v11  ;;  %v1401_v51 = vadd.f32 %v2177_v39, %v1400_v14  ;;  %v1409_v38 = vor.u32 1.1754944e-38, %v1408_v56 }
 0x1a4   : > { %vm1416_vm8 = vweird.f32 %v3384_v48  ;;  %vm983_vm9 = vcmp.eq.f32.partialorder %v3246_v43, inf  ;;  %v669_v15 = vmul.f32 %v3369_v42, %v668_v58  ;;  %vm671_vm10 = vcmp.eq.f32.partialorder %v3309_v31, inf }
 0x1a5   : > { %v1415_v16 = vadd.f32 %v2179_v44, %v1414_v12  ;;  %vm1421_vm12 = vcmp.eq.f32.partialorder %v1420_v3, 8.507059e+37  ;;  %v654_v54 = vmul.f32 %v3474_v63, %v653_v18  ;;  %vm841_vm13 = vcmp.eq.f32.partialorder %v3000_v40, 0.0  ;;  %vm1418_vm15 = vmor %vm1416_vm8, %vm1417_vm7 }
 0x1a6   : > { %vm829_vm14 = vcmp.eq.f32.partialorder %v3017_v52, 0.0  ;;  %v751_v14 = vmul.f32 0.5, %v750_v59  ;;  %v1405_v56 = vsel %vm1404_vm11, %v2177_v39, %v1401_v51  ;;  %v1423_v48 = vor.u32 1.1754944e-38, %v1422_v23  ;;  %v3503_v58 = vpop.eup %2182 }
 0x1a7   : > { %v4632_v42 = vand.u32 2147483648, %v3042_v27  ;;  %v1410_v11 = vsel %vm3483_vm6, %v1409_v38, %v1405_v56  ;;  %v1419_v55 = vsel %vm1418_vm15, %v2179_v44, %v1415_v16  ;;  %v4633_v3 = vand.u32 2147483648, %v3032_v35 }
 0x1a8   : > { %v884_v23 = vsub.f32 1.5, %v883_v46  ;;  %v1424_v18 = vsel %vm1421_vm12, %v1423_v48, %v1419_v55  ;;  %v1522_v12 = vmul.f32 %v1410_v11, %v2819_v60  ;;  %v893_v27 = vmul.f32 %v3503_v58, %v3457_v20 }
 0x1a9   : > { %v615_v7 = vsel %vm613_vm1, %v4632_v42, %v3265_v9  ;;  %v627_v39 = vsel %vm625_vm2, %v4633_v3, %v3253_v50  ;;  %v3517_v9 = vpop.eup %2184  ;;  %v1523_v38 = vmul.f32 %v1424_v18, %v2803_v53  ;;  %v655_v44 = vmul.f32 0.5, %v654_v54 }
 0x1aa   : > { %v3512_v59 = vadd.f32 1e-06, %v615_v7  ;;  %v3520_v49 = vadd.f32 1e-06, %v627_v39  ;;  %v670_v35 = vmul.f32 %v669_v15, %v3309_v31  ;;  %v752_v50 = vsub.f32 1.5, %v751_v14 }
 0x1ab   : > { %v1558_v46 = vmul.f32 %v3379_v57, %v1522_v12  ;;  %v905_v60 = vmul.f32 %v3517_v9, %v3467_v28  ;;  %v1559_v16 = vmul.f32 %v3379_v57, %v1523_v38  ;;  %v894_v56 = vmul.f32 %v3503_v58, %v893_v27 }
 0x1ac   : > { %2186 = vrcp.f32 %v3512_v59  ;;  %v3535_v53 = vsel %vm731_vm5, %v3210_v41, %v3452_v33  ;;  %v885_v15 = vmul.f32 %v3398_v29, %v884_v23  ;;  %v890_v54 = vand.u32 2147483648, %v3348_v37 }
 0x1ad   : > { %2188 = vrcp.f32 %v3520_v49  ;;  %v1595_v14 = vadd.f32 %v3407_v62, %v1558_v46  ;;  %v1596_v42 = vadd.f32 %v3407_v62, %v1559_v16  ;;  %v656_v7 = vsub.f32 1.5, %v655_v44 }
 0x1ae   : > { %v906_v11 = vmul.f32 %v3517_v9, %v905_v60  ;;  %v3547_v55 = vsel %vm983_vm9, %v3246_v43, %v3461_v8  ;;  %v3552_v29 = vsel %vm671_vm10, %v3309_v31, %v670_v35  ;;  %v753_v33 = vmul.f32 %v3423_v32, %v752_v50 }
 0x1af   : > { %v1615_v23 = vpack.c.bf16 %v1596_v42, %v1595_v14  ;;  %v895_v18 = vmul.f32 0.5, %v894_v56  ;;  %v4634_v12 = vand.u32 2147483648, %v3017_v52  ;;  %v4635_v8 = vand.u32 2147483648, %v3000_v40 }
 0x1b0   : > { %v3567_v44 = vmul.f32 %v885_v15, %v3348_v37  ;;  %v1042_v50 = vand.u32 2147483647, %v3512_v59  ;;  %v657_v52 = vmul.f32 %v3474_v63, %v656_v7  ;;  %v3578_v40 = vmul.f32 %v753_v33, %v3354_v30  ;;  %v511_v33 = vpop.xlane.xlu2 %510 }
 0x1b1   : > { %v831_v27 = vsel %vm829_vm14, %v4634_v12, %v3217_v45  ;;  %v843_v38 = vsel %vm841_vm13, %v4635_v8, %v3136_v22  ;;  %1760 = vmatmul.bf16.vlgmr.msra.gmra.mxu3 %v1615_v23  ;;  %v907_v45 = vmul.f32 0.5, %v906_v11  ;;  %v1044_v56 = vand.u32 2147483648, %v3512_v59  ;;  %v525_v23 = vpop.xlane.xlu1 %524 }
 0x1b2   : > { %v2187_v39 = vpop.eup %2186  ;;  %v3573_v60 = vadd.f32 1e-06, %v831_v27  ;;  %v3575_v16 = vadd.f32 1e-06, %v843_v38  ;;  %v896_v14 = vsub.f32 1.5, %v895_v18  ;;  %vm1038_vm0 = vweird.f32 %v3512_v59 }
 0x1b3   : > { %v1034_v35 = vmul.f32 %v2187_v39, %v3512_v59  ;;  %v2189_v46 = vpop.eup %2188  ;;  %v1056_v42 = vand.u32 2147483647, %v3520_v49  ;;  %vm1039_vm1 = vweird.f32 %v2187_v39  ;;  %v1058_v11 = vand.u32 2147483648, %v3520_v49 }
 0x1b4   : > { %v1048_v15 = vmul.f32 %v2189_v46, %v3520_v49  ;;  %2190 = vrcp.f32 %v3573_v60  ;;  %v3587_v12 = vmul.f32 %v657_v52, %v3393_v13  ;;  %v908_v27 = vsub.f32 1.5, %v907_v45  ;;  %vm1040_vm4 = vmor %vm1038_vm0, %vm1039_vm1 }
 0x1b5   : > { %v1035_v22 = vsub.f32 1.0, %v1034_v35  ;;  %vm3589_vm2 = vcmp.eq.f32.partialorder %v1042_v50, 8.507059e+37  ;;  %2192 = vrcp.f32 %v3575_v16  ;;  %v1045_v38 = vor.u32 1.1754944e-38, %v1044_v56 }
 0x1b6   : > { %v1049_v7 = vsub.f32 1.0, %v1048_v15  ;;  %vm1053_vm3 = vweird.f32 %v2189_v46  ;;  %vm1052_vm5 = vweird.f32 %v3520_v49  ;;  %v3601_v52 = vmul.f32 %v2990_v10, %v525_v23  ;;  %v513_v15 = vpop.xlane.xlu0 %512 }
 0x1b7   : > { %v1036_v63 = vmul.f32 %v2187_v39, %v1035_v22  ;;  %v3595_v22 = vmul.f32 %v3503_v58, %v896_v14  ;;  %v3604_v50 = vmul.f32 %v2990_v10, %v511_v33  ;;  %vm709_vm6 = vcmp.eq.f32.partialorder %v3025_v2, 0.0  ;;  %vm1054_vm9 = vmor %vm1052_vm5, %vm1053_vm3 }
 0x1b8   : > { %v1050_v35 = vmul.f32 %v2189_v46, %v1049_v7  ;;  %vm721_vm7 = vcmp.eq.f32.partialorder %v3053_v24, 0.0  ;;  %vm1057_vm8 = vcmp.eq.f32.partialorder %v1056_v42, 8.507059e+37  ;;  %v1059_v58 = vor.u32 1.1754944e-38, %v1058_v11 }
 0x1b9   : > { %v1037_v18 = vadd.f32 %v2187_v39, %v1036_v63  ;;  %v3609_v59 = vmul.f32 %v3517_v9, %v908_v27  ;;  %v1294_v63 = vand.u32 2147483647, %v3573_v60  ;;  %2194 = vrsqrt.f32 %v3601_v52 }
 0x1ba   : > { %v1051_v56 = vadd.f32 %v2189_v46, %v1050_v35  ;;  %v2191_v14 = vpop.eup %2190  ;;  %vm1290_vm10 = vweird.f32 %v3573_v60  ;;  %v1296_v9 = vand.u32 2147483648, %v3573_v60  ;;  %2196 = vrsqrt.f32 %v3604_v50 }
 0x1bb   : > { %v1041_v45 = vsel %vm1040_vm4, %v2187_v39, %v1037_v18  ;;  %v1286_v42 = vmul.f32 %v2191_v14, %v3573_v60  ;;  %v2193_v11 = vpop.eup %2192  ;;  %v3622_v33 = vmul.f32 %v2990_v10, %v513_v15  ;;  %vm1291_vm11 = vweird.f32 %v2191_v14 }
 0x1bc   : > { %v1046_v49 = vsel %vm3589_vm2, %v1045_v38, %v1041_v45  ;;  %v1055_v7 = vsel %vm1054_vm9, %v2189_v46, %v1051_v56  ;;  %vm3627_vm12 = vcmp.eq.f32.partialorder %v1294_v63, 8.507059e+37  ;;  %vm1304_vm13 = vweird.f32 %v3575_v16  ;;  %vm1292_vm3 = vmor %vm1290_vm10, %vm1291_vm11 }
 0x1bd   : > { %v1496_v39 = vmul.f32 %v1046_v49, %v2840_v6  ;;  %v1060_v23 = vsel %vm1057_vm8, %v1059_v58, %v1055_v7  ;;  %v1287_v46 = vsub.f32 1.0, %v1286_v42  ;;  %v1300_v6 = vmul.f32 %v2193_v11, %v3575_v16 }
 0x1be   : > { %v1497_v27 = vmul.f32 %v1060_v23, %v2837_v1  ;;  %v1310_v38 = vand.u32 2147483648, %v3575_v16  ;;  %vm887_vm14 = vcmp.eq.f32.partialorder %v3348_v37, inf  ;;  %v1297_v15 = vor.u32 1.1754944e-38, %v1296_v9  ;;  %v563_v23 = vpop.xlane.xlu1 %562 }
 0x1bf   : > { %v1532_v8 = vmul.f32 %v3379_v57, %v1496_v39  ;;  %v1288_v56 = vmul.f32 %v2191_v14, %v1287_v46  ;;  %v1301_v1 = vsub.f32 1.0, %v1300_v6  ;;  %v3635_v58 = vpop.eup %2194  ;;  %vm1305_vm15 = vweird.f32 %v2193_v11 }
 0x1c0   : > { %v1533_v35 = vmul.f32 %v3379_v57, %v1497_v27  ;;  %v1308_v49 = vand.u32 2147483647, %v3575_v16  ;;  %2198 = vrsqrt.f32 %v3622_v33  ;;  %vm755_vm0 = vcmp.eq.f32.partialorder %v3354_v30, inf  ;;  %v3646_v9 = vpop.eup %2196  ;;  %vm1306_vm4 = vmor %vm1304_vm13, %vm1305_vm15 }
 0x1c1   : > { %v1569_v45 = vadd.f32 %v3407_v62, %v1532_v8  ;;  %vm659_vm1 = vcmp.eq.f32.partialorder %v3393_v13, inf  ;;  %vm899_vm2 = vcmp.eq.f32.partialorder %v3457_v20, inf  ;;  %v1289_v7 = vadd.f32 %v2191_v14, %v1288_v56  ;;  %v4640_v8 = vld [vmem:[#allocation42_spill] sm:$0xff] }
 0x1c2   : > { %v1570_v63 = vadd.f32 %v3407_v62, %v1533_v35  ;;  %v1302_v39 = vmul.f32 %v2193_v11, %v1301_v1  ;;  %v761_v42 = vmul.f32 %v3635_v58, %v3601_v52  ;;  %v1311_v27 = vor.u32 1.1754944e-38, %v1310_v38 }
 0x1c3   : > { %v4641_v46 = vand.u32 2147483648, %v3025_v2  ;;  %v4642_v35 = vand.u32 2147483648, %v3053_v24  ;;  %v3662_v1 = vmul.f32 %v2990_v10, %v563_v23  ;;  %v1293_v48 = vsel %vm1292_vm3, %v2191_v14, %v1289_v7  ;;  %v4643_v14 = vld [vmem:[#allocation13_spill] sm:$0xff]  ;;  %v4644_v7 = vld [vmem:[#allocation12_spill] sm:$0xff] }
 0x1c4   : > { %v1602_v32 = vpack.c.bf16 %v1570_v63, %v1569_v45  ;;  %v1303_v60 = vadd.f32 %v2193_v11, %v1302_v39  ;;  %v762_v38 = vmul.f32 %v3635_v58, %v761_v42  ;;  %v1298_v51 = vsel %vm3627_vm12, %v1297_v15, %v1293_v48 }
 0x1c5   : > { %v711_v6 = vsel %vm709_vm6, %v4641_v46, %v4640_v8  ;;  %v723_v56 = vsel %vm721_vm7, %v4642_v35, %v3286_v34  ;;  %v677_v2 = vmul.f32 %v3646_v9, %v3604_v50  ;;  %vm1309_vm5 = vcmp.eq.f32.partialorder %v1308_v49, 8.507059e+37  ;;  %v529_v46 = vpop.xlane.xlu2 %528 }
 0x1c6   : > { %v3672_v24 = vadd.f32 1e-06, %v711_v6  ;;  %v3674_v34 = vadd.f32 1e-06, %v723_v56  ;;  %1695 = vmatmul.bf16.vlgmr.msra.gmra.mxu0 %v1602_v32  ;;  %v1307_v45 = vsel %vm1306_vm4, %v2193_v11, %v1303_v60  ;;  %v1514_v63 = vmul.f32 %v1298_v51, %v4643_v14  ;;  %v2199_v18 = vpop.eup %2198 }
 0x1c7   : > { %2200 = vrsqrt.f32 %v3662_v1  ;;  %v898_v48 = vmul.f32 %v3595_v22, %v3457_v20  ;;  %v1312_v16 = vsel %vm1309_vm5, %v1311_v27, %v1307_v45  ;;  %v678_v15 = vmul.f32 %v3646_v9, %v677_v2 }
 0x1c8   : > { %2202 = vrcp.f32 %v3672_v24  ;;  %v1515_v39 = vmul.f32 %v1312_v16, %v4644_v7  ;;  %v1550_v42 = vmul.f32 %v3379_v57, %v1514_v63  ;;  %v763_v32 = vmul.f32 0.5, %v762_v38 }
 0x1c9   : > { %v689_v11 = vmul.f32 %v2199_v18, %v3622_v33  ;;  %v910_v51 = vmul.f32 %v3609_v59, %v3467_v28  ;;  %vm911_vm6 = vcmp.eq.f32.partialorder %v3467_v28, inf  ;;  %v679_v49 = vmul.f32 0.5, %v678_v15 }
 0x1ca   : > { %2204 = vrcp.f32 %v3674_v34  ;;  %vm637_vm7 = vcmp.eq.f32.partialorder %v3087_v36, 0.0  ;;  %v3694_v22 = vsel %vm887_vm14, %v3348_v37, %v3567_v44  ;;  %v1551_v23 = vmul.f32 %v3379_v57, %v1515_v39 }
 0x1cb   : > { %v1587_v27 = vadd.f32 %v3407_v62, %v1550_v42  ;;  %v690_v8 = vmul.f32 %v2199_v18, %v689_v11  ;;  %vm649_vm8 = vcmp.eq.f32.partialorder %v3110_v47, 0.0  ;;  %v3703_v59 = vsel %vm755_vm0, %v3354_v30, %v3578_v40 }
 0x1cc   : > { %v3709_v44 = vsel %vm659_vm1, %v3393_v13, %v3587_v12  ;;  %v3714_v6 = vsel %vm899_vm2, %v3457_v20, %v898_v48  ;;  %v1588_v60 = vadd.f32 %v3407_v62, %v1551_v23  ;;  %v764_v38 = vsub.f32 1.5, %v763_v32 }
 0x1cd   : > { %v3717_v56 = vpop.eup %2200  ;;  %v691_v40 = vmul.f32 0.5, %v690_v8  ;;  %v1154_v2 = vand.u32 2147483647, %v3672_v24  ;;  %vm853_vm9 = vcmp.eq.f32.partialorder %v3100_v25, 0.0  ;;  %v3725_v12 = vsel %vm911_vm6, %v3467_v28, %v910_v51 }
 0x1ce   : > { %v2203_v45 = vpop.eup %2202  ;;  %v680_v14 = vsub.f32 1.5, %v679_v49  ;;  %v1156_v63 = vand.u32 2147483648, %v3672_v24  ;;  %v3729_v48 = vmul.f32 %v2990_v10, %v529_v46  ;;  %v1611_v16 = vpack.c.bf16 %v1588_v60, %v1587_v27  ;;  %v4645_v49 = vld [vmem:[#allocation39_spill] sm:$0xff] }
 0x1cf   : > { %v1146_v39 = vmul.f32 %v2203_v45, %v3672_v24  ;;  %v692_v32 = vsub.f32 1.5, %v691_v40  ;;  %vm1150_vm10 = vweird.f32 %v3672_v24  ;;  %v989_v51 = vmul.f32 %v3717_v56, %v3662_v1 }
 0x1d0   : > { %v2205_v42 = vpop.eup %2204  ;;  %vm865_vm11 = vcmp.eq.f32.partialorder %v4645_v49, 0.0  ;;  %1740 = vmatmul.bf16.gmra.mxu2 %v1611_v16  ;;  %v765_v23 = vmul.f32 %v3635_v58, %v764_v38  ;;  %vm3740_vm12 = vcmp.eq.f32.partialorder %v1154_v2, 8.507059e+37  ;;  %vm767_vm13 = vcmp.eq.f32.partialorder %v3601_v52, inf }
 0x1d1   : > { %v1147_v27 = vsub.f32 1.0, %v1146_v39  ;;  %v1160_v46 = vmul.f32 %v2205_v42, %v3674_v34  ;;  %v681_v60 = vmul.f32 %v3646_v9, %v680_v14  ;;  %v1157_v40 = vor.u32 1.1754944e-38, %v1156_v63 }
 0x1d2   : > { %vm1164_vm14 = vweird.f32 %v3674_v34  ;;  %2206 = vrsqrt.f32 %v3729_v48  ;;  %vm683_vm15 = vcmp.eq.f32.partialorder %v3604_v50, inf  ;;  %vm1151_vm0 = vweird.f32 %v2203_v45 }
 0x1d3   : > { %v1148_v16 = vmul.f32 %v2203_v45, %v1147_v27  ;;  %v1161_v58 = vsub.f32 1.0, %v1160_v46  ;;  %v1168_v38 = vand.u32 2147483647, %v3674_v34  ;;  %v693_v2 = vmul.f32 %v2199_v18, %v692_v32  ;;  %vm1152_vm3 = vmor %vm1150_vm10, %vm1151_vm0 }
 0x1d4   : > { %v1170_v39 = vand.u32 2147483648, %v3674_v34  ;;  %v990_v11 = vmul.f32 %v3717_v56, %v989_v51  ;;  %v4648_v9 = vand.u32 2147483648, %v3087_v36  ;;  %vm695_vm1 = vcmp.eq.f32.partialorder %v3622_v33, inf }
 0x1d5   : > { %v1149_v63 = vadd.f32 %v2203_v45, %v1148_v16  ;;  %v1162_v7 = vmul.f32 %v2205_v42, %v1161_v58  ;;  %vm1165_vm2 = vweird.f32 %v2205_v42  ;;  %v4649_v27 = vand.u32 2147483648, %v3110_v47 }
 0x1d6   : > { %v639_v14 = vsel %vm637_vm7, %v4648_v9, %v3321_v5  ;;  %v766_v32 = vmul.f32 %v765_v23, %v3601_v52  ;;  %v682_v51 = vmul.f32 %v681_v60, %v3604_v50  ;;  %vm1169_vm4 = vcmp.eq.f32.partialorder %v1168_v38, 8.507059e+37  ;;  %vm1166_vm5 = vmor %vm1164_vm14, %vm1165_vm2  ;;  %v4651_v38 = vld [vmem:[#allocation14_spill] sm:$0xff] }
 0x1d7   : > { %v651_v18 = vsel %vm649_vm8, %v4649_v27, %v3419_v17  ;;  %v3768_v36 = vadd.f32 1e-06, %v639_v14  ;;  %v1153_v46 = vsel %vm1152_vm3, %v2203_v45, %v1149_v63  ;;  %v1163_v16 = vadd.f32 %v2205_v42, %v1162_v7 }
 0x1d8   : > { %v3770_v5 = vadd.f32 1e-06, %v651_v18  ;;  %v4650_v58 = vand.u32 2147483648, %v3100_v25  ;;  %v2207_v17 = vpop.eup %2206  ;;  %v1158_v23 = vsel %vm3740_vm12, %v1157_v40, %v1153_v46  ;;  %v1171_v24 = vor.u32 1.1754944e-38, %v1170_v39 }
 0x1d9   : > { %v991_v60 = vmul.f32 0.5, %v990_v11  ;;  %2208 = vrcp.f32 %v3768_v36  ;;  %v694_v45 = vmul.f32 %v693_v2, %v3622_v33  ;;  %v1167_v7 = vsel %vm1166_vm5, %v2205_v42, %v1163_v16  ;;  %v4654_v42 = vld [vmem:[#allocation16_spill] sm:$0xff] }
 0x1da   : > { %v855_v47 = vsel %vm853_vm9, %v4650_v58, %v3413_v4  ;;  %v1504_v9 = vmul.f32 %v1158_v23, %v4651_v38  ;;  %v785_v14 = vmul.f32 %v2207_v17, %v3729_v48  ;;  %v1172_v25 = vsel %vm1169_vm4, %v1171_v24, %v1167_v7  ;;  %v4652_v4 = vld [vmem:[#allocation43_spill] sm:$0xff]  ;;  %v4655_v16 = vld [vmem:[#allocation40_spill] sm:$0xff] }
 0x1db   : > { %2210 = vrcp.f32 %v3770_v5  ;;  %v4653_v8 = vand.u32 2147483648, %v4645_v49  ;;  %v3791_v40 = vadd.f32 1e-06, %v855_v47  ;;  %v3796_v11 = vsel %vm767_vm13, %v3601_v52, %v766_v32 }
 0x1dc   : > { %v1505_v2 = vmul.f32 %v1172_v25, %v4654_v42  ;;  %v1540_v39 = vmul.f32 %v3379_v57, %v1504_v9  ;;  %v786_v63 = vmul.f32 %v2207_v17, %v785_v14  ;;  %v3803_v27 = vsel %vm683_vm15, %v3604_v50, %v682_v51 }
 0x1dd   : > { %v867_v34 = vsel %vm865_vm11, %v4653_v8, %v4652_v4  ;;  %v992_v18 = vsub.f32 1.5, %v991_v60  ;;  %vm949_vm6 = vcmp.eq.f32.partialorder %v4655_v16, 0.0  ;;  %vm961_vm7 = vcmp.eq.f32.partialorder %v3148_v0, 0.0 }
 0x1de   : > { %v1541_v32 = vmul.f32 %v3379_v57, %v1505_v2  ;;  %v787_v58 = vmul.f32 0.5, %v786_v63  ;;  %v1070_v47 = vand.u32 2147483647, %v3768_v36  ;;  %v3811_v23 = vadd.f32 1e-06, %v867_v34  ;;  %v527_v63 = vpop.xlane.xlu1 %526 }
 0x1df   : > { %v2209_v24 = vpop.eup %2208  ;;  %v3816_v51 = vsel %vm695_vm1, %v3622_v33, %v694_v45  ;;  %v1072_v60 = vand.u32 2147483648, %v3768_v36  ;;  %v1084_v7 = vand.u32 2147483647, %v3770_v5  ;;  %2212 = vrcp.f32 %v3791_v40 }
 0x1e0   : > { %v1577_v38 = vadd.f32 %v3407_v62, %v1540_v39  ;;  %v1578_v9 = vadd.f32 %v3407_v62, %v1541_v32  ;;  %v1062_v14 = vmul.f32 %v2209_v24, %v3768_v36  ;;  %v1086_v25 = vand.u32 2147483648, %v3770_v5 }
 0x1e1   : > { %v2211_v4 = vpop.eup %2210  ;;  %v3826_v8 = vmul.f32 %v3717_v56, %v992_v18  ;;  %v788_v45 = vsub.f32 1.5, %v787_v58  ;;  %vm1066_vm8 = vweird.f32 %v3768_v36  ;;  %2214 = vrcp.f32 %v3811_v23 }
 0x1e2   : > { %v1606_v34 = vpack.c.bf16 %v1578_v9, %v1577_v38  ;;  %v1063_v42 = vsub.f32 1.0, %v1062_v14  ;;  %vm3830_vm9 = vcmp.eq.f32.partialorder %v1070_v47, 8.507059e+37  ;;  %v1076_v39 = vmul.f32 %v2211_v4, %v3770_v5 }
 0x1e3   : > { %v1073_v32 = vor.u32 1.1754944e-38, %v1072_v60  ;;  %vm1080_vm10 = vweird.f32 %v3770_v5  ;;  %vm3836_vm11 = vcmp.eq.f32.partialorder %v1084_v7, 8.507059e+37  ;;  %v1322_v18 = vand.u32 2147483647, %v3791_v40 }
 0x1e4   : > { %1715 = vmatmul.bf16.vlgmr.msra.gmra.mxu1 %v1606_v34  ;;  %v1064_v58 = vmul.f32 %v2209_v24, %v1063_v42  ;;  %vm1067_vm12 = vweird.f32 %v2209_v24  ;;  %v1077_v38 = vsub.f32 1.0, %v1076_v39  ;;  %v1087_v47 = vor.u32 1.1754944e-38, %v1086_v25 }
 0x1e5   : > { %v2213_v9 = vpop.eup %2212  ;;  %v789_v14 = vmul.f32 %v2207_v17, %v788_v45  ;;  %vm1318_vm13 = vweird.f32 %v3791_v40  ;;  %v1324_v46 = vand.u32 2147483648, %v3791_v40  ;;  %v3844_v60 = vmul.f32 %v2990_v10, %v527_v63  ;;  %vm1068_vm1 = vmor %vm1066_vm8, %vm1067_vm12  ;;  %v4662_v10 = vld [vmem:[#allocation44_spill] sm:$0xff] }
 0x1e6   : > { %vm733_vm14 = vcmp.eq.f32.partialorder %v3210_v41, 0.0  ;;  %v1065_v7 = vadd.f32 %v2209_v24, %v1064_v58  ;;  %v1078_v49 = vmul.f32 %v2211_v4, %v1077_v38  ;;  %vm1081_vm15 = vweird.f32 %v2211_v4 }
 0x1e7   : > { %v1314_v34 = vmul.f32 %v2213_v9, %v3791_v40  ;;  %vm1332_vm0 = vweird.f32 %v3811_v23  ;;  %v2215_v42 = vpop.eup %2214  ;;  %vm3852_vm2 = vcmp.eq.f32.partialorder %v1322_v18, 8.507059e+37  ;;  %2216 = vrsqrt.f32 %v3844_v60  ;;  %vm1082_vm4 = vmor %vm1080_vm10, %vm1081_vm15 }
 0x1e8   : > { %v4663_v25 = vand.u32 2147483648, %v4655_v16  ;;  %v4664_v39 = vand.u32 2147483648, %v3148_v0  ;;  %vm791_vm3 = vcmp.eq.f32.partialorder %v3729_v48, inf  ;;  %v1069_v36 = vsel %vm1068_vm1, %v2209_v24, %v1065_v7  ;;  %v4665_v24 = vld [vmem:[#allocation18_spill] sm:$0xff] }
 0x1e9   : > { %v1079_v18 = vadd.f32 %v2211_v4, %v1078_v49  ;;  %v1315_v58 = vsub.f32 1.0, %v1314_v34  ;;  %v1328_v38 = vmul.f32 %v2215_v42, %v3811_v23  ;;  %v1074_v35 = vsel %vm3830_vm9, %v1073_v32, %v1069_v36 }
 0x1ea   : > { %v951_v45 = vsel %vm949_vm6, %v4663_v25, %v4662_v10  ;;  %v963_v63 = vsel %vm961_vm7, %v4664_v39, %v3434_v61  ;;  %vm1319_vm5 = vweird.f32 %v2213_v9  ;;  %v1336_v16 = vand.u32 2147483647, %v3811_v23  ;;  %v4666_v10 = vld [vmem:[#allocation20_spill] sm:$0xff] }
 0x1eb   : > { %v1338_v0 = vand.u32 2147483648, %v3811_v23  ;;  %vm745_vm6 = vcmp.eq.f32.partialorder %v3129_v21, 0.0  ;;  %v1083_v61 = vsel %vm1082_vm4, %v2211_v4, %v1079_v18  ;;  %v1498_v49 = vmul.f32 %v1074_v35, %v4665_v24  ;;  %vm1320_vm8 = vmor %vm1318_vm13, %vm1319_vm5 }
 0x1ec   : > { %v1316_v7 = vmul.f32 %v2213_v9, %v1315_v58  ;;  %v1329_v34 = vsub.f32 1.0, %v1328_v38  ;;  %v1088_v2 = vsel %vm3836_vm11, %v1087_v47, %v1083_v61  ;;  %vm1333_vm7 = vweird.f32 %v2215_v42 }
 0x1ed   : > { %v3880_v32 = vadd.f32 1e-06, %v951_v45  ;;  %v3882_v5 = vadd.f32 1e-06, %v963_v63  ;;  %v1499_v25 = vmul.f32 %v1088_v2, %v4666_v10  ;;  %v1534_v39 = vmul.f32 %v3379_v57, %v1498_v49  ;;  %v2217_v3 = vpop.eup %2216  ;;  %vm1334_vm10 = vmor %vm1332_vm0, %vm1333_vm7 }
 0x1ee   : > { %v1317_v36 = vadd.f32 %v2213_v9, %v1316_v7  ;;  %v1330_v15 = vmul.f32 %v2215_v42, %v1329_v34  ;;  %v790_v4 = vmul.f32 %v789_v14, %v3729_v48  ;;  %v1325_v35 = vor.u32 1.1754944e-38, %v1324_v46 }
 0x1ef   : > { %vm3890_vm9 = vcmp.eq.f32.partialorder %v1336_v16, 8.507059e+37  ;;  %2218 = vrcp.f32 %v3880_v32  ;;  %v1535_v47 = vmul.f32 %v3379_v57, %v1499_v25  ;;  %v1571_v45 = vadd.f32 %v3407_v62, %v1534_v39 }
 0x1f0   : > { %v1321_v63 = vsel %vm1320_vm8, %v2213_v9, %v1317_v36  ;;  %v1331_v18 = vadd.f32 %v2215_v42, %v1330_v15  ;;  %v1339_v40 = vor.u32 1.1754944e-38, %v1338_v0  ;;  %v773_v46 = vmul.f32 %v2217_v3, %v3844_v60  ;;  %v4670_v15 = vld [vmem:[#allocation19_spill] sm:$0xff] }
 0x1f1   : > { %v1326_v14 = vsel %vm3852_vm2, %v1325_v35, %v1321_v63  ;;  %v4669_v58 = vand.u32 2147483648, %v3210_v41  ;;  %v1572_v16 = vadd.f32 %v3407_v62, %v1535_v47  ;;  %2220 = vrcp.f32 %v3882_v5  ;;  %v4671_v0 = vld [vmem:[#allocation15_spill] sm:$0xff] }
 0x1f2   : > { %v1335_v9 = vsel %vm1334_vm10, %v2215_v42, %v1331_v18  ;;  %v1516_v61 = vmul.f32 %v1326_v14, %v4670_v15  ;;  %vm877_vm11 = vcmp.eq.f32.partialorder %v3154_v26, 0.0  ;;  %v3914_v23 = vmul.f32 %v3826_v8, %v3662_v1 }
 0x1f3   : > { %v735_v38 = vsel %vm733_vm14, %v4669_v58, %v3535_v53  ;;  %v3919_v17 = vsel %vm791_vm3, %v3729_v48, %v790_v4  ;;  %v1340_v41 = vsel %vm3890_vm9, %v1339_v40, %v1335_v9  ;;  %v774_v53 = vmul.f32 %v2217_v3, %v773_v46 }
 0x1f4   : > { %vm889_vm12 = vcmp.eq.f32.partialorder %v3348_v37, 0.0  ;;  %v1603_v42 = vpack.c.bf16 %v1572_v16, %v1571_v45  ;;  %v1517_v24 = vmul.f32 %v1340_v41, %v4671_v0  ;;  %v1552_v49 = vmul.f32 %v3379_v57, %v1516_v61  ;;  %v4677_v0 = vld [vmem:[#allocation45_spill] sm:$0xff]  ;;  %v4059_v61 = vld [vmem:[%s4540_s2] ss:$0 sm:$0xff] }
 0x1f5   : > { %v1434_v7 = vand.u32 2147483647, %v3880_v32  ;;  %v2219_v8 = vpop.eup %2218  ;;  %v775_v34 = vmul.f32 0.5, %v774_v53  ;;  %v1436_v2 = vand.u32 2147483648, %v3880_v32  ;;  %v4672_v10 = vand.u32 2147483648, %v3129_v21 }
 0x1f6   : > { %v3933_v39 = vadd.f32 1e-06, %v735_v38  ;;  %1700 = vmatmul.bf16.gmra.mxu0 %v1603_v42  ;;  %v1553_v36 = vmul.f32 %v3379_v57, %v1517_v24  ;;  %v1589_v4 = vadd.f32 %v3407_v62, %v1552_v49  ;;  %v1426_v35 = vmul.f32 %v2219_v8, %v3880_v32 }
 0x1f7   : > { %v747_v25 = vsel %vm745_vm6, %v4672_v10, %v3429_v19  ;;  %v1448_v56 = vand.u32 2147483647, %v3882_v5  ;;  %v776_v47 = vsub.f32 1.5, %v775_v34  ;;  %v1450_v45 = vand.u32 2147483648, %v3882_v5  ;;  %v2221_v21 = vpop.eup %2220 }
 0x1f8   : > { %v3940_v63 = vadd.f32 1e-06, %v747_v25  ;;  %2222 = vrcp.f32 %v3933_v39  ;;  %v1590_v19 = vadd.f32 %v3407_v62, %v1553_v36  ;;  %v782_v18 = vand.u32 2147483648, %v3844_v60 }
 0x1f9   : > { %v1427_v14 = vsub.f32 1.0, %v1426_v35  ;;  %vm1430_vm13 = vweird.f32 %v3880_v32  ;;  %vm1431_vm14 = vweird.f32 %v2219_v8  ;;  %vm3946_vm15 = vcmp.eq.f32.partialorder %v1434_v7, 8.507059e+37  ;;  %v4679_v7 = vld [vmem:[#allocation41_spill] sm:$0xff] }
 0x1fa   : > { %v1437_v46 = vor.u32 1.1754944e-38, %v1436_v2  ;;  %v1440_v58 = vmul.f32 %v2221_v21, %v3882_v5  ;;  %v1612_v38 = vpack.c.bf16 %v1590_v19, %v1589_v4  ;;  %v777_v16 = vmul.f32 %v2217_v3, %v776_v47  ;;  %vm1432_vm5 = vmor %vm1430_vm13, %vm1431_vm14 }
 0x1fb   : > { %v1428_v9 = vmul.f32 %v2219_v8, %v1427_v14  ;;  %2224 = vrcp.f32 %v3940_v63  ;;  %vm779_vm0 = vcmp.eq.f32.partialorder %v3844_v60, inf  ;;  %vm1444_vm1 = vweird.f32 %v3882_v5 }
 0x1fc   : > { %v1441_v15 = vsub.f32 1.0, %v1440_v58  ;;  %vm3954_vm2 = vcmp.eq.f32.partialorder %v1448_v56, 8.507059e+37  ;;  %v1451_v41 = vor.u32 1.1754944e-38, %v1450_v45  ;;  %1745 = vmatmul.bf16.gmra.mxu2 %v1612_v38  ;;  %vm1445_vm3 = vweird.f32 %v2221_v21 }
 0x1fd   : > { %v1429_v53 = vadd.f32 %v2219_v8, %v1428_v9  ;;  %v1182_v42 = vand.u32 2147483647, %v3933_v39  ;;  %v4678_v3 = vand.u32 2147483648, %v3154_v26  ;;  %vm973_vm4 = vcmp.eq.f32.partialorder %v4679_v7, 0.0  ;;  %vm1446_vm8 = vmor %vm1444_vm1, %vm1445_vm3 }
 0x1fe   : > { %v2223_v49 = vpop.eup %2222  ;;  %v1442_v34 = vmul.f32 %v2221_v21, %v1441_v15  ;;  %v1184_v2 = vand.u32 2147483648, %v3933_v39  ;;  %v891_v10 = vsel %vm889_vm12, %v890_v54, %v3694_v22  ;;  %v778_v26 = vmul.f32 %v777_v16, %v3844_v60  ;;  %v4680_v54 = vld [vmem:[#allocation17_spill] sm:$0xff]  ;;  %v4683_v16 = vld [vmem:[#allocation22_spill] sm:$0xff] }
 0x1ff   : > { %v879_v24 = vsel %vm877_vm11, %v4678_v3, %v4677_v0  ;;  %v1433_v36 = vsel %vm1432_vm5, %v2219_v8, %v1429_v53  ;;  %v1174_v4 = vmul.f32 %v2223_v49, %v3933_v39  ;;  %vm1178_vm6 = vweird.f32 %v3933_v39 }
 0x200   : > { %v3974_v25 = vadd.f32 1e-06, %v879_v24  ;;  %vm985_vm7 = vcmp.eq.f32.partialorder %v3246_v43, 0.0  ;;  %v1438_v32 = vsel %vm3946_vm15, %v1437_v46, %v1433_v36  ;;  %v1443_v35 = vadd.f32 %v2221_v21, %v1442_v34 }
 0x201   : > { %v1196_v56 = vand.u32 2147483647, %v3940_v63  ;;  %v3983_v47 = vadd.f32 1e-06, %v891_v10  ;;  %v2225_v37 = vpop.eup %2224  ;;  %v1524_v22 = vmul.f32 %v1438_v32, %v4680_v54  ;;  %v1175_v8 = vsub.f32 1.0, %v1174_v4 }
 0x202   : > { %v1198_v45 = vand.u32 2147483648, %v3940_v63  ;;  %2226 = vrcp.f32 %v3974_v25  ;;  %v1447_v19 = vsel %vm1446_vm8, %v2221_v21, %v1443_v35  ;;  %vm3991_vm9 = vcmp.eq.f32.partialorder %v1182_v42, 8.507059e+37 }
 0x203   : > { %v1185_v40 = vor.u32 1.1754944e-38, %v1184_v2  ;;  %v1188_v46 = vmul.f32 %v2225_v37, %v3940_v63  ;;  %v1452_v58 = vsel %vm3954_vm2, %v1451_v41, %v1447_v19  ;;  %v1560_v5 = vmul.f32 %v3379_v57, %v1524_v22  ;;  %v4012_v41 = vld [vmem:[#allocation5] ss:$0 sm:$0xff] }
 0x204   : > { %v1176_v38 = vmul.f32 %v2223_v49, %v1175_v8  ;;  %vm1179_vm10 = vweird.f32 %v2223_v49  ;;  %v1525_v9 = vmul.f32 %v1452_v58, %v4683_v16  ;;  %vm1192_vm11 = vweird.f32 %v3940_v63 }
 0x205   : > { %v1189_v15 = vsub.f32 1.0, %v1188_v46  ;;  %2228 = vrcp.f32 %v3983_v47  ;;  %v4005_v21 = vsel %vm779_vm0, %v3844_v60, %v778_v26  ;;  %vm4007_vm12 = vcmp.eq.f32.partialorder %v1196_v56, 8.507059e+37  ;;  %vm1180_vm14 = vmor %vm1178_vm6, %vm1179_vm10  ;;  %v4686_v26 = vld [vmem:[#allocation46_spill] sm:$0xff] }
 0x206   : > { %v1177_v53 = vadd.f32 %v2223_v49, %v1176_v38  ;;  %v1199_v57 = vor.u32 1.1754944e-38, %v1198_v45  ;;  %vm661_vm13 = vcmp.eq.f32.partialorder %v3393_v13, 0.0  ;;  %v1561_v42 = vmul.f32 %v4012_v41, %v1525_v9  ;;  %v4690_v38 = vld [vmem:[#allocation21_spill] sm:$0xff] }
 0x207   : > { %v1190_v0 = vmul.f32 %v2225_v37, %v1189_v15  ;;  %vm1193_vm15 = vweird.f32 %v2225_v37  ;;  %v1350_v3 = vand.u32 2147483647, %v3974_v25  ;;  %v1597_v34 = vadd.f32 %v3407_v62, %v1560_v5 }
 0x208   : > { %v2227_v24 = vpop.eup %2226  ;;  %v1181_v2 = vsel %vm1180_vm14, %v2223_v49, %v1177_v53  ;;  %v1352_v10 = vand.u32 2147483648, %v3974_v25  ;;  %v4687_v36 = vand.u32 2147483648, %v4679_v7  ;;  %vm673_vm0 = vcmp.eq.f32.partialorder %v3309_v31, 0.0  ;;  %vm1194_vm1 = vmor %vm1192_vm11, %vm1193_vm15  ;;  %v4688_v49 = vld [vmem:[#allocation25_spill] sm:$0xff] }
 0x209   : > { %v1598_v39 = vadd.f32 %v3407_v62, %v1561_v42  ;;  %v1186_v32 = vsel %vm3991_vm9, %v1185_v40, %v1181_v2  ;;  %v1191_v35 = vadd.f32 %v2225_v37, %v1190_v0  ;;  %v1342_v56 = vmul.f32 %v2227_v24, %v3974_v25 }
 0x20a   : > { %v975_v4 = vsel %vm973_vm4, %v4687_v36, %v4686_v26  ;;  %v1506_v54 = vmul.f32 %v1186_v32, %v4688_v49  ;;  %v1364_v22 = vand.u32 2147483647, %v3983_v47  ;;  %v1366_v7 = vand.u32 2147483648, %v3983_v47 }
 0x20b   : > { %v4689_v8 = vand.u32 2147483648, %v3246_v43  ;;  %v2229_v45 = vpop.eup %2228  ;;  %v1616_v19 = vpack.c.bf16 %v1598_v39, %v1597_v34  ;;  %v1195_v14 = vsel %vm1194_vm1, %v2225_v37, %v1191_v35  ;;  %v1343_v40 = vsub.f32 1.0, %v1342_v56  ;;  %v4697_v35 = vld [vmem:[#allocation23_spill] sm:$0xff] }
 0x20c   : > { %v4040_v46 = vadd.f32 1e-06, %v975_v4  ;;  %v1200_v63 = vsel %vm4007_vm12, %v1199_v57, %v1195_v14  ;;  %v1542_v58 = vmul.f32 %v4012_v41, %v1506_v54  ;;  %vm1347_vm2 = vweird.f32 %v2227_v24  ;;  %v4698_v14 = vld [vmem:[#allocation28_spill] sm:$0xff] }
 0x20d   : > { %v987_v62 = vsel %vm985_vm7, %v4689_v8, %v3547_v55  ;;  %v1356_v5 = vmul.f32 %v2229_v45, %v3983_v47  ;;  %1765 = vmatmul.bf16.gmra.mxu3 %v1616_v19  ;;  %v1507_v16 = vmul.f32 %v1200_v63, %v4690_v38  ;;  %v1344_v9 = vmul.f32 %v2227_v24, %v1343_v40 }
 0x20e   : > { %v4047_v43 = vadd.f32 1e-06, %v987_v62  ;;  %2230 = vrcp.f32 %v4040_v46  ;;  %vm1346_vm3 = vweird.f32 %v3974_v25  ;;  %vm4051_vm4 = vcmp.eq.f32.partialorder %v1350_v3, 8.507059e+37 }
 0x20f   : > { %v1353_v37 = vor.u32 1.1754944e-38, %v1352_v10  ;;  %v1357_v15 = vsub.f32 1.0, %v1356_v5  ;;  %v1543_v53 = vmul.f32 %v4012_v41, %v1507_v16  ;;  %v1579_v57 = vadd.f32 %v4059_v61, %v1542_v58  ;;  %vm1348_vm5 = vmor %vm1346_vm3, %vm1347_vm2 }
 0x210   : > { %v1345_v42 = vadd.f32 %v2227_v24, %v1344_v9  ;;  %2232 = vrcp.f32 %v4047_v43  ;;  %vm1360_vm6 = vweird.f32 %v3983_v47  ;;  %vm1361_vm7 = vweird.f32 %v2229_v45 }
 0x211   : > { %v1358_v25 = vmul.f32 %v2229_v45, %v1357_v15  ;;  %v4693_v0 = vand.u32 2147483648, %v3393_v13  ;;  %vm757_vm8 = vcmp.eq.f32.partialorder %v3354_v30, 0.0  ;;  %v1580_v34 = vadd.f32 %v4059_v61, %v1543_v53  ;;  %vm1362_vm11 = vmor %vm1360_vm6, %vm1361_vm7 }
 0x212   : > { %v1349_v2 = vsel %vm1348_vm5, %v2227_v24, %v1345_v42  ;;  %vm4072_vm9 = vcmp.eq.f32.partialorder %v1364_v22, 8.507059e+37  ;;  %v1367_v26 = vor.u32 1.1754944e-38, %v1366_v7  ;;  %vm769_vm10 = vcmp.eq.f32.partialorder %v3601_v52, 0.0 }
 0x213   : > { %v663_v3 = vsel %vm661_vm13, %v4693_v0, %v3709_v44  ;;  %v1354_v36 = vsel %vm4051_vm4, %v1353_v37, %v1349_v2  ;;  %v1359_v4 = vadd.f32 %v2229_v45, %v1358_v25  ;;  %v1462_v39 = vand.u32 2147483647, %v4040_v46 }
 0x214   : > { %v4696_v13 = vand.u32 2147483648, %v3309_v31  ;;  %v2231_v24 = vpop.eup %2230  ;;  %v1607_v32 = vpack.c.bf16 %v1580_v34, %v1579_v57  ;;  %v1518_v56 = vmul.f32 %v1354_v36, %v4697_v35  ;;  %v1464_v49 = vand.u32 2147483648, %v4040_v46 }
 0x215   : > { %v4089_v54 = vadd.f32 1e-06, %v663_v3  ;;  %v1363_v22 = vsel %vm1362_vm11, %v2229_v45, %v1359_v4  ;;  %v1454_v7 = vmul.f32 %v2231_v24, %v4040_v46  ;;  %v1476_v8 = vand.u32 2147483647, %v4047_v43 }
 0x216   : > { %v675_v44 = vsel %vm673_vm0, %v4696_v13, %v3552_v29  ;;  %v2233_v31 = vpop.eup %2232  ;;  %1720 = vmatmul.bf16.gmra.mxu1 %v1607_v32  ;;  %v1368_v29 = vsel %vm4072_vm9, %v1367_v26, %v1363_v22  ;;  %v1554_v47 = vmul.f32 %v4012_v41, %v1518_v56  ;;  %v1478_v19 = vand.u32 2147483648, %v4047_v43  ;;  %v4706_v22 = vld [vmem:[#allocation26_spill] sm:$0xff] }
 0x217   : > { %v4093_v62 = vadd.f32 1e-06, %v675_v44  ;;  %2234 = vrcp.f32 %v4089_v54  ;;  %v1519_v40 = vmul.f32 %v1368_v29, %v4698_v14  ;;  %v1455_v45 = vsub.f32 1.0, %v1454_v7 }
 0x218   : > { %vm1458_vm12 = vweird.f32 %v4040_v46  ;;  %v1468_v63 = vmul.f32 %v2233_v31, %v4047_v43  ;;  %vm4103_vm13 = vcmp.eq.f32.partialorder %v1462_v39, 8.507059e+37  ;;  %v1465_v5 = vor.u32 1.1754944e-38, %v1464_v49 }
 0x219   : > { %vm1472_vm14 = vweird.f32 %v4047_v43  ;;  %2236 = vrcp.f32 %v4093_v62  ;;  %v1555_v38 = vmul.f32 %v4012_v41, %v1519_v40  ;;  %v1456_v16 = vmul.f32 %v2231_v24, %v1455_v45 }
 0x21a   : > { %vm1459_vm15 = vweird.f32 %v2231_v24  ;;  %v1469_v9 = vsub.f32 1.0, %v1468_v63  ;;  %v1591_v55 = vadd.f32 %v4059_v61, %v1554_v47  ;;  %vm1473_vm0 = vweird.f32 %v2233_v31 }
 0x21b   : > { %vm4111_vm1 = vcmp.eq.f32.partialorder %v1476_v8, 8.507059e+37  ;;  %v1479_v15 = vor.u32 1.1754944e-38, %v1478_v19  ;;  %vm901_vm2 = vcmp.eq.f32.partialorder %v3457_v20, 0.0  ;;  %v1592_v53 = vadd.f32 %v4059_v61, %v1555_v38  ;;  %vm1460_vm3 = vmor %vm1458_vm12, %vm1459_vm15 }
 0x21c   : > { %v1457_v57 = vadd.f32 %v2231_v24, %v1456_v16  ;;  %v1470_v42 = vmul.f32 %v2233_v31, %v1469_v9  ;;  %v4703_v25 = vand.u32 2147483648, %v3354_v30  ;;  %vm1094_vm4 = vweird.f32 %v4089_v54  ;;  %vm1474_vm5 = vmor %vm1472_vm14, %vm1473_vm0 }
 0x21d   : > { %v2235_v3 = vpop.eup %2234  ;;  %v1098_v34 = vand.u32 2147483647, %v4089_v54  ;;  %v4704_v2 = vand.u32 2147483648, %v3601_v52  ;;  %v1613_v36 = vpack.c.bf16 %v1592_v53, %v1591_v55  ;;  %v1100_v13 = vand.u32 2147483648, %v4089_v54 }
 0x21e   : > { %v759_v0 = vsel %vm757_vm8, %v4703_v25, %v3703_v59  ;;  %v1461_v4 = vsel %vm1460_vm3, %v2231_v24, %v1457_v57  ;;  %v1471_v30 = vadd.f32 %v2233_v31, %v1470_v42  ;;  %v1090_v59 = vmul.f32 %v2235_v3, %v4089_v54  ;;  %v4712_v25 = vld [vmem:[#allocation31_spill] sm:$0xff] }
 0x21f   : > { %v771_v10 = vsel %vm769_vm10, %v4704_v2, %v3796_v11  ;;  %v4131_v26 = vadd.f32 1e-06, %v759_v0  ;;  %v2237_v39 = vpop.eup %2236  ;;  %v1466_v46 = vsel %vm4103_vm13, %v1465_v5, %v1461_v4  ;;  %vm913_vm6 = vcmp.eq.f32.partialorder %v3467_v28, 0.0  ;;  %1750 = vmatmul.bf16.gmra.mxu2 %v1613_v36  ;;  %v4705_v11 = vld [vmem:[#allocation24_spill] sm:$0xff]  ;;  %v4714_v4 = vld [vmem:[#allocation27_spill] sm:$0xff] }
 0x220   : > { %v4140_v44 = vadd.f32 1e-06, %v771_v10  ;;  %v1475_v52 = vsel %vm1474_vm5, %v2233_v31, %v1471_v30  ;;  %v1526_v24 = vmul.f32 %v1466_v46, %v4705_v11  ;;  %v1091_v32 = vsub.f32 1.0, %v1090_v59 }
 0x221   : > { %2238 = vrcp.f32 %v4131_v26  ;;  %v1104_v35 = vmul.f32 %v2237_v39, %v4093_v62  ;;  %v1480_v56 = vsel %vm4111_vm1, %v1479_v15, %v1475_v52  ;;  %vm1095_vm7 = vweird.f32 %v2235_v3 }
 0x222   : > { %v1112_v43 = vand.u32 2147483647, %v4093_v62  ;;  %v1114_v49 = vand.u32 2147483648, %v4093_v62  ;;  %v1527_v7 = vmul.f32 %v1480_v56, %v4706_v22  ;;  %v1562_v8 = vmul.f32 %v4012_v41, %v1526_v24  ;;  %vm1096_vm12 = vmor %vm1094_vm4, %vm1095_vm7 }
 0x223   : > { %v1092_v29 = vmul.f32 %v2235_v3, %v1091_v32  ;;  %v1105_v47 = vsub.f32 1.0, %v1104_v35  ;;  %vm4152_vm8 = vcmp.eq.f32.partialorder %v1098_v34, 8.507059e+37  ;;  %vm1108_vm9 = vweird.f32 %v4093_v62 }
 0x224   : > { %vm1109_vm10 = vweird.f32 %v2237_v39  ;;  %2240 = vrcp.f32 %v4140_v44  ;;  %vm685_vm11 = vcmp.eq.f32.partialorder %v3604_v50, 0.0  ;;  %v1563_v19 = vmul.f32 %v4012_v41, %v1527_v7 }
 0x225   : > { %v1599_v14 = vadd.f32 %v4059_v61, %v1562_v8  ;;  %v1093_v40 = vadd.f32 %v2235_v3, %v1092_v29  ;;  %v1106_v45 = vmul.f32 %v2237_v39, %v1105_v47  ;;  %v1101_v58 = vor.u32 1.1754944e-38, %v1100_v13  ;;  %vm1110_vm14 = vmor %vm1108_vm9, %vm1109_vm10 }
 0x226   : > { %vm4164_vm13 = vcmp.eq.f32.partialorder %v1112_v43, 8.507059e+37  ;;  %v1115_v38 = vor.u32 1.1754944e-38, %v1114_v49  ;;  %v4711_v16 = vand.u32 2147483648, %v3457_v20  ;;  %v1600_v55 = vadd.f32 %v4059_v61, %v1563_v19  ;;  %v4718_v19 = vld [vmem:[#allocation29_spill] sm:$0xff] }
 0x227   : > { %v2239_v63 = vpop.eup %2238  ;;  %v1097_v37 = vsel %vm1096_vm12, %v2235_v3, %v1093_v40  ;;  %v1107_v15 = vadd.f32 %v2237_v39, %v1106_v45  ;;  %vm1206_vm15 = vweird.f32 %v4131_v26  ;;  %v1210_v57 = vand.u32 2147483647, %v4131_v26 }
 0x228   : > { %v903_v9 = vsel %vm901_vm2, %v4711_v16, %v3714_v6  ;;  %v1202_v53 = vmul.f32 %v2239_v63, %v4131_v26  ;;  %v1102_v54 = vsel %vm4152_vm8, %v1101_v58, %v1097_v37  ;;  %v1212_v20 = vand.u32 2147483648, %v4131_v26  ;;  %v1736_v26 = vpop.f32.mrf.mxu2 }
 0x229   : > { %vm697_vm0 = vcmp.eq.f32.partialorder %v3622_v33, 0.0  ;;  %v1617_v6 = vpack.c.bf16 %v1600_v55, %v1599_v14  ;;  %v1111_v42 = vsel %vm1110_vm14, %v2237_v39, %v1107_v15  ;;  %v1500_v0 = vmul.f32 %v1102_v54, %v4712_v25 }
 0x22a   : > { %v1203_v3 = vsub.f32 1.0, %v1202_v53  ;;  %v2241_v34 = vpop.eup %2240  ;;  %v1116_v2 = vsel %vm4164_vm13, %v1115_v38, %v1111_v42  ;;  %vm1207_vm1 = vweird.f32 %v2239_v63  ;;  %v4713_v62 = vand.u32 2147483648, %v3467_v28 }
 0x22b   : > { %v4192_v36 = vadd.f32 1e-06, %v903_v9  ;;  %1770 = vmatmul.bf16.gmra.mxu3 %v1617_v6  ;;  %v1501_v30 = vmul.f32 %v1116_v2, %v4714_v4  ;;  %v1536_v59 = vmul.f32 %v4012_v41, %v1500_v0  ;;  %v1216_v46 = vmul.f32 %v2241_v34, %v4140_v44  ;;  %vm1208_vm3 = vmor %vm1206_vm15, %vm1207_vm1 }
 0x22c   : > { %v915_v10 = vsel %vm913_vm6, %v4713_v62, %v3725_v12  ;;  %v1204_v39 = vmul.f32 %v2239_v63, %v1203_v3  ;;  %v1224_v13 = vand.u32 2147483647, %v4140_v44  ;;  %v1226_v52 = vand.u32 2147483648, %v4140_v44 }
 0x22d   : > { %v4199_v11 = vadd.f32 1e-06, %v915_v10  ;;  %2242 = vrcp.f32 %v4192_v36  ;;  %vm995_vm2 = vcmp.eq.f32.partialorder %v3662_v1, inf  ;;  %v1537_v28 = vmul.f32 %v4012_v41, %v1501_v30 }
 0x22e   : > { %v1573_v12 = vadd.f32 %v4059_v61, %v1536_v59  ;;  %v1205_v24 = vadd.f32 %v2239_v63, %v1204_v39  ;;  %v1217_v32 = vsub.f32 1.0, %v1216_v46  ;;  %vm1211_vm4 = vcmp.eq.f32.partialorder %v1210_v57, 8.507059e+37 }
 0x22f   : > { %v1213_v35 = vor.u32 1.1754944e-38, %v1212_v20  ;;  %2244 = vrcp.f32 %v4199_v11  ;;  %v4715_v56 = vand.u32 2147483648, %v3604_v50  ;;  %v1574_v49 = vadd.f32 %v4059_v61, %v1537_v28 }
 0x230   : > { %v1209_v22 = vsel %vm1208_vm3, %v2239_v63, %v1205_v24  ;;  %v1218_v7 = vmul.f32 %v2241_v34, %v1217_v32  ;;  %vm1221_vm5 = vweird.f32 %v2241_v34  ;;  %vm1220_vm6 = vweird.f32 %v4140_v44 }
 0x231   : > { %v687_v43 = vsel %vm685_vm11, %v4715_v56, %v3803_v27  ;;  %v1214_v8 = vsel %vm1211_vm4, %v1213_v35, %v1209_v22  ;;  %vm4216_vm7 = vcmp.eq.f32.partialorder %v1224_v13, 8.507059e+37  ;;  %v1227_v29 = vor.u32 1.1754944e-38, %v1226_v52  ;;  %vm1222_vm8 = vmor %vm1220_vm6, %vm1221_vm5 }
 0x232   : > { %v1604_v47 = vpack.c.bf16 %v1574_v49, %v1573_v12  ;;  %v1219_v31 = vadd.f32 %v2241_v34, %v1218_v7  ;;  %v1508_v14 = vmul.f32 %v1214_v8, %v4718_v19  ;;  %v1378_v50 = vand.u32 2147483647, %v4192_v36  ;;  %v4728_v49 = vld [vmem:[#allocation32_spill] sm:$0xff] }
 0x233   : > { %v2243_v27 = vpop.eup %2242  ;;  %vm1374_vm9 = vweird.f32 %v4192_v36  ;;  %v1380_v40 = vand.u32 2147483648, %v4192_v36  ;;  %v4719_v44 = vand.u32 2147483648, %v3622_v33  ;;  %v4229_v63 = vadd.f32 1e-06, %v687_v43 }
 0x234   : > { %vm781_vm10 = vcmp.eq.f32.partialorder %v3844_v60, 0.0  ;;  %1705 = vmatmul.bf16.gmra.mxu0 %v1604_v47  ;;  %v1223_v58 = vsel %vm1222_vm8, %v2241_v34, %v1219_v31  ;;  %v1370_v5 = vmul.f32 %v2243_v27, %v4192_v36  ;;  %vm1388_vm11 = vweird.f32 %v4199_v11 }
 0x235   : > { %v699_v45 = vsel %vm697_vm0, %v4719_v44, %v3816_v51  ;;  %v1392_v38 = vand.u32 2147483647, %v4199_v11  ;;  %v2245_v16 = vpop.eup %2244  ;;  %v1228_v9 = vsel %vm4216_vm7, %v1227_v29, %v1223_v58  ;;  %v1544_v55 = vmul.f32 %v4012_v41, %v1508_v14  ;;  %v4720_v51 = vld [vmem:[#allocation34_spill] sm:$0xff]  ;;  %v4301_v14 = vpop.f32.mrf.mxu3  ;;  %v4309_v44 = vld [vmem:[%s4542_s4] ss:$0 sm:$0xff] }
 0x236   : > { %v4238_v33 = vadd.f32 1e-06, %v699_v45  ;;  %2246 = vrcp.f32 %v4229_v63  ;;  %vm793_vm12 = vcmp.eq.f32.partialorder %v3729_v48, 0.0  ;;  %v1509_v37 = vmul.f32 %v1228_v9, %v4720_v51 }
 0x237   : > { %v1371_v15 = vsub.f32 1.0, %v1370_v5  ;;  %vm4243_vm13 = vcmp.eq.f32.partialorder %v1378_v50, 8.507059e+37  ;;  %v1384_v54 = vmul.f32 %v2245_v16, %v4199_v11  ;;  %vm1375_vm14 = vweird.f32 %v2243_v27 }
 0x238   : > { %v1394_v57 = vand.u32 2147483648, %v4199_v11  ;;  %2248 = vrcp.f32 %v4238_v33  ;;  %v996_v20 = vsel %vm995_vm2, %v3662_v1, %v3914_v23  ;;  %v1545_v6 = vmul.f32 %v4012_v41, %v1509_v37  ;;  %vm1376_vm2 = vmor %vm1374_vm9, %vm1375_vm14 }
 0x239   : > { %v1372_v42 = vmul.f32 %v2243_v27, %v1371_v15  ;;  %v1385_v25 = vsub.f32 1.0, %v1384_v54  ;;  %v1126_v0 = vand.u32 2147483647, %v4229_v63  ;;  %v1581_v3 = vadd.f32 %v4059_v61, %v1544_v55 }
 0x23a   : > { %v1381_v34 = vor.u32 1.1754944e-38, %v1380_v40  ;;  %vm1389_vm15 = vweird.f32 %v2245_v16  ;;  %vm4257_vm0 = vcmp.eq.f32.partialorder %v1392_v38, 8.507059e+37  ;;  %v1582_v62 = vadd.f32 %v4059_v61, %v1545_v6  ;;  %v4733_v6 = vld [vmem:[#allocation35_spill] sm:$0xff] }
 0x23b   : > { %v1373_v10 = vadd.f32 %v2243_v27, %v1372_v42  ;;  %v1386_v4 = vmul.f32 %v2245_v16, %v1385_v25  ;;  %vm997_vm1 = vcmp.eq.f32.partialorder %v3662_v1, 0.0  ;;  %v1395_v30 = vor.u32 1.1754944e-38, %v1394_v57  ;;  %vm1390_vm6 = vmor %vm1388_vm11, %vm1389_vm15 }
 0x23c   : > { %v2247_v23 = vpop.eup %2246  ;;  %vm1122_vm3 = vweird.f32 %v4229_v63  ;;  %v1128_v59 = vand.u32 2147483648, %v4229_v63  ;;  %v4725_v39 = vand.u32 2147483648, %v3662_v1  ;;  %v1608_v13 = vpack.c.bf16 %v1582_v62, %v1581_v3 }
 0x23d   : > { %v1377_v52 = vsel %vm1376_vm2, %v2243_v27, %v1373_v10  ;;  %v1387_v28 = vadd.f32 %v2245_v16, %v1386_v4  ;;  %v1118_v12 = vmul.f32 %v2247_v23, %v4229_v63  ;;  %vm4271_vm4 = vcmp.eq.f32.partialorder %v1126_v0, 8.507059e+37  ;;  %v1738_v0 = vpop.f32.mrf.mxu2 }
 0x23e   : > { %v999_v46 = vsel %vm997_vm1, %v4725_v39, %v996_v20  ;;  %vm1136_vm5 = vweird.f32 %v4238_v33  ;;  %v2249_v36 = vpop.eup %2248  ;;  %v1382_v32 = vsel %vm4243_vm13, %v1381_v34, %v1377_v52  ;;  %v1140_v1 = vand.u32 2147483647, %v4238_v33  ;;  %1725 = vmatmul.bf16.gmra.mxu1 %v1608_v13  ;;  %v4736_v34 = vld [vmem:[#allocation33_spill] sm:$0xff] }
 0x23f   : > { %v4282_v35 = vadd.f32 1e-06, %v999_v46  ;;  %v783_v56 = vsel %vm781_vm10, %v782_v18, %v4005_v21  ;;  %v1391_v43 = vsel %vm1390_vm6, %v2245_v16, %v1387_v28  ;;  %v1520_v22 = vmul.f32 %v1382_v32, %v4728_v49  ;;  %v4730_v18 = vld [vmem:[#allocation30_spill] sm:$0xff] }
 0x240   : > { %v1119_v7 = vsub.f32 1.0, %v1118_v12  ;;  %v1132_v8 = vmul.f32 %v2249_v36, %v4238_v33  ;;  %v1396_v11 = vsel %vm4257_vm0, %v1395_v30, %v1391_v43  ;;  %vm1123_vm7 = vweird.f32 %v2247_v23  ;;  %v2258_v30 = vld [vmem:[%s2648_s16 + $0x80] sm:$0xff]  ;;  %v1763_v12 = vpop.f32.mrf.mxu3 }
 0x241   : > { %2250 = vrcp.f32 %v4282_v35  ;;  %v4729_v29 = vand.u32 2147483648, %v3729_v48  ;;  %v1521_v21 = vmul.f32 %v1396_v11, %v4730_v18  ;;  %v1556_v47 = vmul.f32 %v4012_v41, %v1520_v22  ;;  %vm1124_vm9 = vmor %vm1122_vm3, %vm1123_vm7 }
 0x242   : > { %v1120_v31 = vmul.f32 %v2247_v23, %v1119_v7  ;;  %v1133_v19 = vsub.f32 1.0, %v1132_v8  ;;  %v1129_v50 = vor.u32 1.1754944e-38, %v1128_v59  ;;  %vm1137_vm8 = vweird.f32 %v2249_v36 }
 0x243   : > { %v795_v60 = vsel %vm793_vm12, %v4729_v29, %v3919_v17  ;;  %v1142_v27 = vand.u32 2147483648, %v4238_v33  ;;  %v4304_v40 = vadd.f32 1e-06, %v783_v56  ;;  %v1557_v48 = vmul.f32 %v4012_v41, %v1521_v21  ;;  %vm1138_vm11 = vmor %vm1136_vm5, %vm1137_vm8  ;;  %v2259_v56 = vld [vmem:[%s2648_s16 + $0x88] sm:$0xff]  ;;  %v1696_v29 = vpop.f32.mrf.mxu0 }
 0x244   : > { %v1593_v17 = vadd.f32 %v4059_v61, %v1556_v47  ;;  %v1121_v45 = vadd.f32 %v2247_v23, %v1120_v31  ;;  %v1134_v58 = vmul.f32 %v2249_v36, %v1133_v19  ;;  %vm4316_vm10 = vcmp.eq.f32.partialorder %v1140_v1, 8.507059e+37  ;;  %v2260_v19 = vld [vmem:[%s2648_s16 + $0xd0] sm:$0xff] }
 0x245   : > { %v1490_v38 = vand.u32 2147483647, %v4282_v35  ;;  %v4321_v16 = vadd.f32 1e-06, %v795_v60  ;;  %2252 = vrcp.f32 %v4304_v40  ;;  %v1594_v9 = vadd.f32 %v4059_v61, %v1557_v48  ;;  %v2261_v48 = vld [vmem:[%s2648_s16 + $0xd8] sm:$0xff] }
 0x246   : > { %v1125_v55 = vsel %vm1124_vm9, %v2247_v23, %v1121_v45  ;;  %v1135_v51 = vadd.f32 %v2249_v36, %v1134_v58  ;;  %v1492_v37 = vand.u32 2147483648, %v4282_v35  ;;  %v1143_v53 = vor.u32 1.1754944e-38, %v1142_v27 }
 0x247   : > { %v2251_v15 = vpop.eup %2250  ;;  %v1130_v63 = vsel %vm4271_vm4, %v1129_v50, %v1125_v55  ;;  %2254 = vrcp.f32 %v4321_v16  ;;  %v1737_v54 = vadd.f32 %v4309_v44, %v1736_v26  ;;  %v1614_v57 = vpack.c.bf16 %v1594_v9, %v1593_v17  ;;  %v2262_v9 = vld [vmem:[%s2648_s16] sm:$0xff] }
 0x248   : > { %v1139_v20 = vsel %vm1138_vm11, %v2249_v36, %v1135_v51  ;;  %v1502_v42 = vmul.f32 %v1130_v63, %v4733_v6  ;;  %v1482_v25 = vmul.f32 %v2251_v15, %v4282_v35  ;;  %vm1486_vm12 = vweird.f32 %v4282_v35 }
 0x249   : > { %v1144_v3 = vsel %vm4316_vm10, %v1143_v53, %v1139_v20  ;;  %vm4338_vm13 = vcmp.eq.f32.partialorder %v1490_v38, 8.507059e+37  ;;  %1755 = vmatmul.bf16.gmra.mxu2 %v1614_v57  ;;  %v1493_v4 = vor.u32 1.1754944e-38, %v1492_v37  ;;  %vm1487_vm14 = vweird.f32 %v2251_v15  ;;  %v4738_v57 = vld [vmem:[#allocation38_spill] sm:$0xff] }
 0x24a   : > { %v1503_v2 = vmul.f32 %v1144_v3, %v4736_v34  ;;  %v1538_v62 = vmul.f32 %v4012_v41, %v1502_v42  ;;  %v1483_v10 = vsub.f32 1.0, %v1482_v25  ;;  %vm1234_vm15 = vweird.f32 %v4304_v40  ;;  %vm1488_vm0 = vmor %vm1486_vm12, %vm1487_vm14 }
 0x24b   : > { %v2253_v23 = vpop.eup %2252  ;;  %v1796_v59 = vadd.f32 %v2258_v30, %v1737_v54  ;;  %v1739_v39 = vadd.f32 %v4309_v44, %v1738_v0  ;;  %v1238_v36 = vand.u32 2147483647, %v4304_v40  ;;  %v1240_v32 = vand.u32 2147483648, %v4304_v40  ;;  %v1698_v42 = vpop.f32.mrf.mxu0  ;;  %v4739_v0 = vld [vmem:[#allocation37_spill] sm:$0xff] }
 0x24c   : > { %v1539_v46 = vmul.f32 %v4012_v41, %v1503_v2  ;;  %v1575_v13 = vadd.f32 %v4059_v61, %v1538_v62  ;;  %v1484_v52 = vmul.f32 %v2251_v15, %v1483_v10  ;;  %v1230_v28 = vmul.f32 %v2253_v23, %v4304_v40  ;;  %v2263_v62 = vld [vmem:[%s2648_s16 + $0x8] sm:$0xff] }
 0x24d   : > { %v2255_v24 = vpop.eup %2254  ;;  %v1252_v1 = vand.u32 2147483647, %v4321_v16  ;;  %1829 = vst [vmem:[%s4355_s23 + $0x80] sm:$0xff] %v1796_v59  ;;  %v1797_v43 = vadd.f32 %v2259_v56, %v1739_v39  ;;  %vm1235_vm1 = vweird.f32 %v2253_v23  ;;  %v1254_v26 = vand.u32 2147483648, %v4321_v16  ;;  %v2264_v39 = vld [vmem:[%s2648_s16 + $0x90] sm:$0xff]  ;;  %v2267_v56 = vld [vmem:[%s2648_s16 + $0x48] sm:$0xff] }
 0x24e   : > { %v1576_v49 = vadd.f32 %v4059_v61, %v1539_v46  ;;  %v1485_v22 = vadd.f32 %v2251_v15, %v1484_v52  ;;  %v1231_v7 = vsub.f32 1.0, %v1230_v28  ;;  %v1244_v8 = vmul.f32 %v2255_v24, %v4321_v16  ;;  %vm1236_vm3 = vmor %vm1234_vm15, %vm1235_vm1  ;;  %v2265_v52 = vld [vmem:[%s2648_s16 + $0x98] sm:$0xff] }
 0x24f   : > { %1830 = vst [vmem:[%s4355_s23 + $0x88] sm:$0xff] %v1797_v43  ;;  %v1762_v11 = vadd.f32 %v4309_v44, %v4301_v14  ;;  %v1764_v60 = vadd.f32 %v4309_v44, %v1763_v12  ;;  %v1697_v27 = vadd.f32 %v4309_v44, %v1696_v29  ;;  %v4737_v14 = vld [vmem:[#allocation36_spill] sm:$0xff]  ;;  %vm1249_vm2 = vweird.f32 %v2255_v24 }
 0x250   : > { %v1605_v18 = vpack.c.bf16 %v1576_v49, %v1575_v13  ;;  %v1489_v21 = vsel %vm1488_vm0, %v2251_v15, %v1485_v22  ;;  %v1232_v47 = vmul.f32 %v2253_v23, %v1231_v7  ;;  %v1245_v31 = vsub.f32 1.0, %v1244_v8  ;;  %v2268_v7 = vld [vmem:[%s2648_s16 + $0x10] sm:$0xff]  ;;  %v2269_v29 = vld [vmem:[%s2648_s16 + $0x18] sm:$0xff] }
 0x251   : > { %v1494_v35 = vsel %vm4338_vm13, %v1493_v4, %v1489_v21  ;;  %v1806_v50 = vadd.f32 %v2260_v19, %v1762_v11  ;;  %v1807_v17 = vadd.f32 %v2261_v48, %v1764_v60  ;;  %vm1239_vm4 = vcmp.eq.f32.partialorder %v1238_v36, 8.507059e+37 }
 0x252   : > { %1710 = vmatmul.bf16.gmra.mxu0 %v1605_v18  ;;  %v1528_v45 = vmul.f32 %v1494_v35, %v4737_v14  ;;  %v1233_v58 = vadd.f32 %v2253_v23, %v1232_v47  ;;  %v1246_v5 = vmul.f32 %v2255_v24, %v1245_v31  ;;  %v1241_v38 = vor.u32 1.1754944e-38, %v1240_v32  ;;  %v2270_v47 = vld [vmem:[%s2648_s16 + $0xa0] sm:$0xff] }
 0x253   : > { %1839 = vst [vmem:[%s4355_s23 + $0xd0] sm:$0xff] %v1806_v50  ;;  %v1780_v55 = vadd.f32 %v2262_v9, %v1697_v27  ;;  %vm1248_vm5 = vweird.f32 %v4321_v16  ;;  %v1255_v53 = vor.u32 1.1754944e-38, %v1254_v26  ;;  %vm1253_vm7 = vcmp.eq.f32.partialorder %v1252_v1, 8.507059e+37  ;;  %v1741_v30 = vpop.f32.mrf.mxu2  ;;  %v2271_v50 = vld [vmem:[%s2648_s16 + $0xa8] sm:$0xff] }
 0x254   : > { %v1564_v51 = vmul.f32 %v4012_v41, %v1528_v45  ;;  %v1237_v37 = vsel %vm1236_vm3, %v2253_v23, %v1233_v58  ;;  %v1247_v15 = vadd.f32 %v2255_v24, %v1246_v5  ;;  %1840 = vst [vmem:[%s4355_s23 + $0xd8] sm:$0xff] %v1807_v17  ;;  %vm1250_vm6 = vmor %vm1248_vm5, %vm1249_vm2  ;;  %v1699_v33 = vadd.f32 %v4309_v44, %v1698_v42  ;;  %v2272_v45 = vld [vmem:[%s2648_s16 + $0xe0] sm:$0xff] }
 0x255   : > { %v1242_v63 = vsel %vm1239_vm4, %v1241_v38, %v1237_v37  ;;  %1813 = vst [vmem:[%s4355_s23] sm:$0xff] %v1780_v55  ;;  %v1742_v59 = vadd.f32 %v4309_v44, %v1741_v30  ;;  %v2273_v38 = vld [vmem:[%s2648_s16 + $0x50] sm:$0xff] }
 0x256   : > { %v1601_v40 = vadd.f32 %v4059_v61, %v1564_v51  ;;  %v1251_v54 = vsel %vm1250_vm6, %v2255_v24, %v1247_v15  ;;  %v1510_v20 = vmul.f32 %v1242_v63, %v4738_v57  ;;  %v1781_v10 = vadd.f32 %v2263_v62, %v1699_v33  ;;  %v2266_v24 = vld [vmem:[%s2648_s16 + $0x40] sm:$0xff]  ;;  %v2274_v15 = vld [vmem:[%s2648_s16 + $0xe8] sm:$0xff]  ;;  %v2277_v33 = vld [vmem:[%s2648_s16 + $0xb8] sm:$0xff] }
 0x257   : > { %v1256_v6 = vsel %vm1253_vm7, %v1255_v53, %v1251_v54  ;;  %v1798_v46 = vadd.f32 %v2264_v39, %v1742_v59  ;;  %v2278_v62 = vld [vmem:[%s2648_s16 + $0xf0] sm:$0xff] }
 0x258   : > { %v1618_v25 = vpack.c.bf16 %v1601_v40, %v1601_v40  ;;  %v1511_v3 = vmul.f32 %v1256_v6, %v4739_v0  ;;  %v1546_v16 = vmul.f32 %v4012_v41, %v1510_v20  ;;  %1814 = vst [vmem:[%s4355_s23 + $0x8] sm:$0xff] %v1781_v10  ;;  %v2275_v40 = vld [vmem:[%s2648_s16 + $0x58] sm:$0xff]  ;;  %v2276_v6 = vld [vmem:[%s2648_s16 + $0xb0] sm:$0xff] }
 0x259   : > { %1831 = vst [vmem:[%s4355_s23 + $0x90] sm:$0xff] %v1798_v46 }
 0x25a   : > { %1775 = vmatmul.bf16.gmra.mxu3 %v1618_v25  ;;  %v1547_v34 = vmul.f32 %v4012_v41, %v1511_v3  ;;  %v1583_v2 = vadd.f32 %v4059_v61, %v1546_v16 }
 0x25b   : > { %v1743_v41 = vpop.f32.mrf.mxu2 }
 0x25c   : > { %v1584_v4 = vadd.f32 %v4059_v61, %v1547_v34  ;;  %v1744_v13 = vadd.f32 %v4309_v44, %v1743_v41  ;;  %v2280_v41 = vld [vmem:[%s2648_s16 + $0xf8] sm:$0xff] }
 0x25e   : > { %v1609_v23 = vpack.c.bf16 %v1584_v4, %v1583_v2  ;;  %v1799_v28 = vadd.f32 %v2265_v52, %v1744_v13 }
 0x260   : > { %1730 = vmatmul.bf16.gmra.mxu1 %v1609_v23  ;;  %1832 = vst [vmem:[%s4355_s23 + $0x98] sm:$0xff] %v1799_v28  ;;  %v2279_v23 = vld [vmem:[%s2648_s16 + $0x20] sm:$0xff] }
 0x261   : > { %v1716_v61 = vpop.f32.mrf.mxu1 }
 0x262   : > { %v1717_v12 = vadd.f32 %v4309_v44, %v1716_v61  ;;  %v2281_v61 = vld [vmem:[%s2648_s16 + $0x28] sm:$0xff] }
 0x264   : > { %v1788_v36 = vadd.f32 %v2266_v24, %v1717_v12 }
 0x266   : > { %1821 = vst [vmem:[%s4355_s23 + $0x40] sm:$0xff] %v1788_v36  ;;  %v2282_v36 = vld [vmem:[%s2648_s16 + $0x60] sm:$0xff] }
 0x269   : > { %v1718_v32 = vpop.f32.mrf.mxu1 }
 0x26a   : > { %v1719_v1 = vadd.f32 %v4309_v44, %v1718_v32 }
 0x26c   : > { %v1789_v43 = vadd.f32 %v2267_v56, %v1719_v1 }
 0x26e   : > { %1822 = vst [vmem:[%s4355_s23 + $0x48] sm:$0xff] %v1789_v43  ;;  %v2283_v43 = vld [vmem:[%s2648_s16 + $0x68] sm:$0xff] }
 0x273   : > { %v1701_v49 = vpop.f32.mrf.mxu0 }
 0x274   : > { %v1702_v22 = vadd.f32 %v4309_v44, %v1701_v49 }
 0x276   : > { %v1782_v8 = vadd.f32 %v2268_v7, %v1702_v22 }
 0x278   : > { %1815 = vst [vmem:[%s4355_s23 + $0x10] sm:$0xff] %v1782_v8 }
 0x27b   : > { %v1703_v26 = vpop.f32.mrf.mxu0 }
 0x27c   : > { %v1704_v11 = vadd.f32 %v4309_v44, %v1703_v26  ;;  %v2284_v26 = vld [vmem:[%s2648_s16 + $0xc0] sm:$0xff] }
 0x27e   : > { %v1783_v60 = vadd.f32 %v2269_v29, %v1704_v11 }
 0x27f   : > { %v1746_v18 = vpop.f32.mrf.mxu2 }
 0x280   : > { %v1747_v21 = vadd.f32 %v4309_v44, %v1746_v18  ;;  %1816 = vst [vmem:[%s4355_s23 + $0x18] sm:$0xff] %v1783_v60  ;;  %v2285_v60 = vld [vmem:[%s2648_s16 + $0x30] sm:$0xff] }
 0x282   : > { %v1800_v31 = vadd.f32 %v2270_v47, %v1747_v21 }
 0x284   : > { %1833 = vst [vmem:[%s4355_s23 + $0xa0] sm:$0xff] %v1800_v31 }
 0x287   : > { %v1748_v35 = vpop.f32.mrf.mxu2 }
 0x288   : > { %v1749_v19 = vadd.f32 %v4309_v44, %v1748_v35  ;;  %v2286_v35 = vld [vmem:[%s2648_s16 + $0xc8] sm:$0xff] }
 0x28a   : > { %v1801_v27 = vadd.f32 %v2271_v50, %v1749_v19 }
 0x28c   : > { %1834 = vst [vmem:[%s4355_s23 + $0xa8] sm:$0xff] %v1801_v27  ;;  %v2287_v27 = vld [vmem:[%s2648_s16 + $0x38] sm:$0xff] }
 0x290   : > { %v1766_v48 = vpop.f32.mrf.mxu3 }
 0x291   : > { %v1767_v17 = vadd.f32 %v4309_v44, %v1766_v48 }
 0x293   : > { %v1721_v14 = vpop.f32.mrf.mxu1  ;;  %v1808_v58 = vadd.f32 %v2272_v45, %v1767_v17 }
 0x294   : > { %v1722_v5 = vadd.f32 %v4309_v44, %v1721_v14 }
 0x295   : > { %1841 = vst [vmem:[%s4355_s23 + $0xe0] sm:$0xff] %v1808_v58 }
 0x296   : > { %v1790_v9 = vadd.f32 %v2273_v38, %v1722_v5  ;;  %v2288_v5 = vld [vmem:[%s2648_s16 + $0x100] sm:$0xff] }
 0x298   : > { %1823 = vst [vmem:[%s4355_s23 + $0x50] sm:$0xff] %v1790_v9  ;;  %v1768_v55 = vpop.f32.mrf.mxu3  ;;  %v2289_v9 = vld [vmem:[%s2648_s16 + $0x70] sm:$0xff] }
 0x299   : > { %v1769_v51 = vadd.f32 %v4309_v44, %v1768_v55 }
 0x29b   : > { %v1723_v37 = vpop.f32.mrf.mxu1  ;;  %v1809_v63 = vadd.f32 %v2274_v15, %v1769_v51 }
 0x29c   : > { %v1724_v53 = vadd.f32 %v4309_v44, %v1723_v37 }
 0x29d   : > { %1842 = vst [vmem:[%s4355_s23 + $0xe8] sm:$0xff] %v1809_v63  ;;  %v2290_v63 = vld [vmem:[%s2648_s16 + $0x78] sm:$0xff] }
 0x29e   : > { %v1791_v54 = vadd.f32 %v2275_v40, %v1724_v53 }
 0x2a0   : > { %1824 = vst [vmem:[%s4355_s23 + $0x58] sm:$0xff] %v1791_v54 }
 0x2a2   : > { %v1751_v57 = vpop.f32.mrf.mxu2 }
 0x2a3   : > { %v1752_v20 = vadd.f32 %v4309_v44, %v1751_v57 }
 0x2a5   : > { %v1802_v42 = vadd.f32 %v2276_v6, %v1752_v20 }
 0x2a7   : > { %1835 = vst [vmem:[%s4355_s23 + $0xb0] sm:$0xff] %v1802_v42 }
 0x2aa   : > { %v1753_v25 = vpop.f32.mrf.mxu2 }
 0x2ab   : > { %v1754_v0 = vadd.f32 %v4309_v44, %v1753_v25 }
 0x2ad   : > { %v1803_v34 = vadd.f32 %v2277_v33, %v1754_v0 }
 0x2ae   : > { %v1771_v3 = vpop.f32.mrf.mxu3 }
 0x2af   : > { %v1772_v16 = vadd.f32 %v4309_v44, %v1771_v3  ;;  %1836 = vst [vmem:[%s4355_s23 + $0xb8] sm:$0xff] %v1803_v34 }
 0x2b1   : > { %v1706_v2 = vpop.f32.mrf.mxu0  ;;  %v1810_v10 = vadd.f32 %v2278_v62, %v1772_v16 }
 0x2b2   : > { %v1707_v4 = vadd.f32 %v4309_v44, %v1706_v2 }
 0x2b3   : > { %1843 = vst [vmem:[%s4355_s23 + $0xf0] sm:$0xff] %v1810_v10 }
 0x2b4   : > { %v1784_v30 = vadd.f32 %v2279_v23, %v1707_v4 }
 0x2b6   : > { %1817 = vst [vmem:[%s4355_s23 + $0x20] sm:$0xff] %v1784_v30  ;;  %v1773_v59 = vpop.f32.mrf.mxu3 }
 0x2b7   : > { %v1774_v39 = vadd.f32 %v4309_v44, %v1773_v59 }
 0x2b9   : > { %v1708_v46 = vpop.f32.mrf.mxu0  ;;  %v1811_v13 = vadd.f32 %v2280_v41, %v1774_v39 }
 0x2ba   : > { %v1709_v52 = vadd.f32 %v4309_v44, %v1708_v46 }
 0x2bb   : > { %v1726_v28 = vpop.f32.mrf.mxu1  ;;  %1844 = vst [vmem:[%s4355_s23 + $0xf8] sm:$0xff] %v1811_v13 }
 0x2bc   : > { %v1785_v12 = vadd.f32 %v2281_v61, %v1709_v52  ;;  %v1727_v24 = vadd.f32 %v4309_v44, %v1726_v28 }
 0x2be   : > { %1818 = vst [vmem:[%s4355_s23 + $0x28] sm:$0xff] %v1785_v12  ;;  %v1792_v32 = vadd.f32 %v2282_v36, %v1727_v24 }
 0x2c0   : > { %1825 = vst [vmem:[%s4355_s23 + $0x60] sm:$0xff] %v1792_v32 }
 0x2c3   : > { %v1728_v1 = vpop.f32.mrf.mxu1 }
 0x2c4   : > { %v1729_v56 = vadd.f32 %v4309_v44, %v1728_v1 }
 0x2c6   : > { %v1793_v49 = vadd.f32 %v2283_v43, %v1729_v56 }
 0x2c8   : > { %1826 = vst [vmem:[%s4355_s23 + $0x68] sm:$0xff] %v1793_v49 }
 0x2cc   : > { %v1756_v22 = vpop.f32.mrf.mxu2 }
 0x2cd   : > { %v1757_v7 = vadd.f32 %v4309_v44, %v1756_v22 }
 0x2cf   : > { %v1711_v8 = vpop.f32.mrf.mxu0  ;;  %v1804_v11 = vadd.f32 %v2284_v26, %v1757_v7 }
 0x2d0   : > { %v1712_v29 = vadd.f32 %v4309_v44, %v1711_v8 }
 0x2d1   : > { %1837 = vst [vmem:[%s4355_s23 + $0xc0] sm:$0xff] %v1804_v11 }
 0x2d2   : > { %v1786_v18 = vadd.f32 %v2285_v60, %v1712_v29 }
 0x2d4   : > { %1819 = vst [vmem:[%s4355_s23 + $0x30] sm:$0xff] %v1786_v18  ;;  %v1758_v21 = vpop.f32.mrf.mxu2 }
 0x2d5   : > { %v1759_v47 = vadd.f32 %v4309_v44, %v1758_v21 }
 0x2d7   : > { %v1713_v31 = vpop.f32.mrf.mxu0  ;;  %v1805_v19 = vadd.f32 %v2286_v35, %v1759_v47 }
 0x2d8   : > { %v1714_v50 = vadd.f32 %v4309_v44, %v1713_v31 }
 0x2d9   : > { %1838 = vst [vmem:[%s4355_s23 + $0xc8] sm:$0xff] %v1805_v19 }
 0x2da   : > { %v1787_v48 = vadd.f32 %v2287_v27, %v1714_v50 }
 0x2dc   : > { %1820 = vst [vmem:[%s4355_s23 + $0x38] sm:$0xff] %v1787_v48 }
 0x2dd   : > { %v1776_v17 = vpop.f32.mrf.mxu3  ;;  %v1731_v14 = vpop.f32.mrf.mxu1 }
 0x2de   : > { %v1777_v45 = vadd.f32 %v4309_v44, %v1776_v17  ;;  %v1732_v58 = vadd.f32 %v4309_v44, %v1731_v14 }
 0x2e0   : > { %v1812_v38 = vadd.f32 %v2288_v5, %v1777_v45  ;;  %v1794_v55 = vadd.f32 %v2289_v9, %v1732_v58 }
 0x2e2   : > { %1845 = vst [vmem:[%s4355_s23 + $0x100] sm:$0xff] %v1812_v38 }
 0x2e3   : > { %1827 = vst [vmem:[%s4355_s23 + $0x70] sm:$0xff] %v1794_v55 }
 0x2e5   : > { %v1778_v51 = vpop.f32.mrf.mxu3  ;;  %v1733_v37 = vpop.f32.mrf.mxu1 }
 0x2e6   : > { %v1734_v15 = vadd.f32 %v4309_v44, %v1733_v37  ;;  %1853 = sbr.rel (!%p2567_p11) target bundleno = 778 (0x30a), region = 56 }
 0x2e8   : > { %v1795_v53 = vadd.f32 %v2290_v63, %v1734_v15 }
 0x2ea   : > { %1828 = vst [vmem:[%s4355_s23 + $0x78] sm:$0xff] %v1795_v53 }
 0x2eb   : > { %s4750_s26 = smov (!%p1856_p6, %s1855_s26), 33 }
 0x2ec   : > { %s2006_s1 = sshll.u32 %s4750_s26, 3 }
 0x2ed   : > { %s1859_s15 = ssub.s32 264, %s2006_s1 }
 0x2ee   : > { %s1860_s12 = sshll.u32 %s1859_s15, 4 }
 0x2ef   : > { %1861 = vsyncadd %s1847_s9, %s1860_s12  ;;  %p4484_p13 = scmp.ne.s32.totalorder %s2006_s1, 0  ;;  %s2022_s3 = smul.u32 264, %s2536_s22 }
 0x2f0   : > { %s1866_s13 = sshll.u32 %s4355_s23, 4  ;;  %s2010_s25 = sshll.u32 %s4750_s26, 7  ;;  %s4494_s13 = int_to_ptr.vmem [resolvable:$true] %s1866_s13 }
 0x2f1   : > { %s1864_s7 = scalar_lea.hbm %s4543_s5, %s2022_s3  ;;  %s2390_s14 = sshra.s32 %s4494_s13, 4  ;;  %s2391_s14 = int_to_ptr.vmem [resolvable:$true] %s2390_s14 }
 0x2f2   : > { %s1868_s11 = sshll.u32 %s1864_s7, 4  ;;  %s2392_s28 = sshrl.u32 %s2010_s25, 4  ;;  %s4496_s11 = int_to_ptr.hbm [resolvable:$true] %s1868_s11 }
 0x2f3   : > { %s2397_s17 = scalar_lea.vmem %s2391_s14, %s2392_s28  ;;  %s2482_s22 = smov [#allocation8]  }
 0x2f4   : > { %p2398_p11 = scmp.ne.s32.totalorder %s2391_s14, %s2397_s17  ;;  %s2401_s23 = scalar_lea.vmem %s2482_s22, 528 }
 0x2f5   : > { %p2403_p9 = scmp.lt.s32.totalorder %s2401_s23, %s2397_s17 }
 0x2f6   : > { %p2399_p2 = pnand %p2398_p11, %p4484_p13 }
 0x2f8   : > { %p2400_p5 = pneg %p2399_p2 }
 0x2fa   : > { %p2405_p10 = pnand %p2403_p9, %p2400_p5 }
 0x2fc   : > { %2408 = shalt.err (!%p2405_p10)
}
 0x2fd   : > { %s2409_s8 = sshra.s32 %s4496_s11, 4  ;;  %s2420_s3 = scalar_lea.hbm %s4543_s5, 520  ;;  %s2410_s8 = int_to_ptr.hbm [resolvable:$true] %s2409_s8 }
 0x2fe   : > { %s2416_s1 = scalar_lea.hbm %s2410_s8, %s2392_s28  ;;  %p2421_p7 = scmp.lt.s32.totalorder %s2410_s8, %s4543_s5 }
 0x2ff   : > { %p2417_p1 = scmp.ne.s32.totalorder %s2410_s8, %s2416_s1  ;;  %p2422_p8 = scmp.lt.s32.totalorder %s2420_s3, %s2416_s1 }
 0x301   : > { %p2418_p0 = pnand %p2417_p1, %p4484_p13  ;;  %p2423_p4 = por %p2422_p8, %p2421_p7 }
 0x303   : > { %p2419_p3 = pneg %p2418_p0 }
 0x305   : > { %p2424_p12 = pnand %p2423_p4, %p2419_p3 }
 0x307   : > { %2427 = shalt.err (!%p2424_p12)
}
 0x308   : > { %s2483_s7 = smov 128   ;;  %s2484_s14 = smov 8  }
 0x309   : > { %1874 = dma.vmem_to_hbm [thread:$0]  (%p4484_p13), %s4494_s13, %s2010_s25, %s4496_s11, %s1847_s9, %s2483_s7, %s2483_s7, %s2484_s14  }
 0x30a PF: > { %s1883_s28 = sand.u32 1, %s2459_s18   ;;  %p4741_p6 = scmp.ne.s32.totalorder %s4584_s6, 0 }
 0x30b   : > { %p4742_p11 = scmp.ge.s32.totalorder %s2471_s21, 2  ;;  %s1884_s17 = scalar_lea.sflag [#allocation4], %s1883_s28 }
 0x30d   : > { %p2067_p2 = pnand %p4742_p11, %p4741_p6 }
 0x30f   : > { %p2068_p5 = pneg %p2067_p2 }
 0x311   : > { %2454 = dma.done.wait (%p2068_p5), %s1884_s17, 4224  }
 0x312   : > { %2456 = vsyncadd (%p2068_p5), %s1884_s17, 4294963072  ;;  %p19_p9 = scmp.ge.s32.totalorder %s2540_s24, 4   ;;  %s4743_s18 = smov %s2463_s19 }
 0x313   : > { %s4744_s19 = smov %s2467_s20  ;;  %s4745_s20 = smov %s2552_s27 }
 0x314   : > { %s4746_s21 = smov %s2540_s24  ;;  %21 = sbr.rel (!%p19_p9) target bundleno = 9 (0x9), region = 93 }
 0x319   :  { %1890 = vsyncpa [#allocation3], 1 }
 0x31a   :  { %1892 = vsyncpa [#allocation3 + $0x1], 1 }
 0x31b   :  { %1893 = vsyncpa [#allocation6], 1 }
 0x31c   :  { %1894 = vsyncpa [#allocation4], 1 }
 0x31d   :  { %1896 = vsyncpa [#allocation4 + $0x1], 1 }

</bundles_post_ra>
